<compile_context>
chip_gen: v6e
topology: v6e:2x2x1
jax: 0.10.0
libtpu: 0.0.40
codegen_flags: <defaults>
</compile_context>

<pallas_src>
import functools

import jax
import jax.numpy as jnp
from jax import lax
from jax.experimental import pallas as pl
from jax.experimental.pallas import tpu as pltpu


def _round_up(x, m):
    return ((x + m - 1) // m) * m


def _block_vmem_bytes(block_shape, dtype):
    """Rough in-VMEM footprint of one block (last dim -> 128 lanes, 2nd-last -> sublanes)."""
    itemsize = jnp.dtype(dtype).itemsize
    sublane = {4: 8, 2: 16, 1: 32}.get(itemsize, 8)
    dims = [int(d) for d in block_shape]
    if not dims:
        return itemsize
    if len(dims) == 1:
        return _round_up(dims[0], 128) * itemsize
    lead = 1
    for d in dims[:-2]:
        lead *= d
    return lead * _round_up(dims[-2], sublane) * _round_up(dims[-1], 128) * itemsize


def _vmem_capacity_bytes():
    try:
        info = pltpu.get_tpu_info()
        cap = getattr(info, "vmem_capacity_bytes", None)
        if cap:
            return int(cap)
    except Exception:
        pass
    return 64 << 20  # conservative default: v7x per-TensorCore VMEM


def _conv_bn_relu_kernel(x_ref, w_ref, shift_ref, o_ref, *,
                         kh, kw, stride, ho, row_pitch):
    """One (batch, Cout-tile) grid cell of fused conv + BN(shift) + ReLU.

    x_ref:     (1, stride*stride, L, Cin)  phase-split, spatially-flattened padded
                                           bf16 image (DMA'd from HBM once per batch)
    w_ref:     (kh*kw, Cin, tile_n)        BN-scale-folded conv taps, bf16
    shift_ref: (1, tile_n)                 BN shift, f32
    o_ref:     (1, ho*row_pitch, tile_n)   bf16 output rows (row_pitch >= true Wo;
                                           the extra columns are sliced off outside)
    """
    cin = x_ref.shape[-1]
    tn = o_ref.shape[-1]
    rows = ho * row_pitch
    acc = jnp.zeros((rows, tn), jnp.float32)
    # kh*kw is a small static constant: unroll the taps.  Each tap is one static 2-D
    # slice of the VMEM-resident image and one MXU matmul with f32 accumulation, so
    # the im2col patch matrix never exists in HBM.
    for i in range(kh):
        for j in range(kw):
            phase = (i % stride) * stride + (j % stride)
            start = (i // stride) * row_pitch + (j // stride)
            patch = x_ref[0, phase, start:start + rows, :]          # (rows, Cin) bf16
            acc = acc + jnp.dot(patch, w_ref[i * kw + j],
                                preferred_element_type=jnp.float32)
    y = jnp.maximum(acc + shift_ref[...], 0.0)                       # BN shift + ReLU
    o_ref[0] = y.astype(o_ref.dtype)


def basic_conv2d(x, weight_oihw, gamma, beta, running_mean, running_var, *,
                 stride, padding, eps=1e-5,
                 input_format="NCHW", output_format="NCHW",
                 out_dtype=jnp.bfloat16, keep_channel_padding=False):
    if input_format == "NCHW":
        N, Cin, H, W = x.shape
        x_nhwc = jnp.transpose(x, (0, 2, 3, 1))
    elif input_format == "NHWC":
        N, H, W, Cin = x.shape
        x_nhwc = x
    else:
        raise ValueError(input_format)

    Cout, Cin_w, kh, kw = weight_oihw.shape
    assert Cin_w == Cin, (Cin_w, Cin)
    s, p = int(stride), int(padding)
    Hp, Wp = H + 2 * p, W + 2 * p
    Ho = (Hp - kh) // s + 1
    Wo = (Wp - kw) // s + 1
    Hs = (Hp + s - 1) // s            # per-phase rows
    Ws = (Wp + s - 1) // s            # per-phase cols == kernel row pitch

    # --- host prep: pad + cast + space-to-batch phase split (one 1x HBM relayout;
    # an identity reshape when stride == 1).  The kernel reads this exactly once. ---
    xb = x_nhwc.astype(jnp.bfloat16)
    xp = jnp.pad(xb, ((0, 0), (p, p + (s * Hs - Hp)), (p, p + (s * Ws - Wp)), (0, 0)))
    xps = xp.reshape(N, Hs, s, Ws, s, Cin).transpose(0, 2, 4, 1, 3, 5)
    xps = xps.reshape(N, s * s, Hs * Ws, Cin)
    # pad the flattened spatial dim so every tap window (offset + Ho*Ws rows) is in bounds
    L = Hs * Ws
    L_req = ((kh - 1) // s) * Ws + (kw - 1) // s + Ho * Ws
    L_pad = _round_up(max(L, L_req), 8)
    xps = jnp.pad(xps, ((0, 0), (0, 0), (0, L_pad - L), (0, 0)))

    # --- fold eval-mode BatchNorm into the weights (scale) and a shift vector ---
    # TODO(synk): training-mode BN (batch statistics + running-stat update) not implemented.
    inv_std = 1.0 / jnp.sqrt(running_var.astype(jnp.float32) + eps)
    scale = gamma.astype(jnp.float32) * inv_std                      # [Cout]
    shift = beta.astype(jnp.float32) - running_mean.astype(jnp.float32) * scale

    Cout_pad = _round_up(Cout, 128)   # lane-dense matmul N dim / unmasked output vst
    # OIHW -> (kh*kw, Cin, Cout), BN scale folded per output column, bf16.
    w_taps = jnp.transpose(weight_oihw.astype(jnp.float32), (2, 3, 1, 0))
    w_taps = w_taps.reshape(kh * kw, Cin, Cout) * scale[None, None, :]
    w_taps = jnp.pad(w_taps, ((0, 0), (0, 0), (0, Cout_pad - Cout))).astype(jnp.bfloat16)
    shift_row = jnp.pad(shift.reshape(1, Cout), ((0, 0), (0, Cout_pad - Cout)))

    # Cout tile: 256 fills the 2x256x256 MXU of v6e/v7x; 128 still saturates v5e.
    tile_n = 256 if Cout_pad % 256 == 0 else 128

    # Generation-aware VMEM budget: ~48 MiB ceiling on v7x (64 MiB physical),
    # ~96 MiB on v5e/v6e (128 MiB physical).
    ceiling = min((_vmem_capacity_bytes() * 3) // 4, 100 << 20)
    rows = Ho * Ws

    def _vmem_estimate(tn):
        blocks = (_block_vmem_bytes((1, s * s, L_pad, Cin), jnp.bfloat16)
                  + _block_vmem_bytes((kh * kw, Cin, tn), jnp.bfloat16)
                  + _block_vmem_bytes((1, tn), jnp.float32)
                  + _block_vmem_bytes((1, rows, tn), out_dtype))
        acc = _block_vmem_bytes((rows, tn), jnp.float32)
        patch = _block_vmem_bytes((rows, Cin), jnp.bfloat16)
        # double-buffered pipeline blocks + f32 accumulator + a couple of tap temps
        return 2 * blocks + acc + 2 * patch + (2 << 20)

    while _vmem_estimate(tile_n) > ceiling and tile_n > 128:
        tile_n //= 2
    # TODO(synk): very large-spatial layers (e.g. a 299x299 stem) would additionally
    # need an Ho-tile grid axis to bound the per-batch VMEM block; not needed here.
    vmem_limit = int(min(ceiling, max(_vmem_estimate(tile_n) + (2 << 20), 16 << 20)))

    grid_n = Cout_pad // tile_n
    grid = (N, grid_n)

    kernel = functools.partial(_conv_bn_relu_kernel,
                               kh=kh, kw=kw, stride=s, ho=Ho, row_pitch=Ws)

    # True (unpadded) cost so XLA's scheduling around the custom call is not skewed.
    cost = pl.CostEstimate(
        flops=2 * N * Ho * Wo * kh * kw * Cin * Cout,
        transcendentals=0,
        bytes_accessed=(N * Hp * Wp * Cin * 2 + kh * kw * Cin * Cout * 2
                        + N * Ho * Wo * Cout * jnp.dtype(out_dtype).itemsize))

    out = pl.pallas_call(
        kernel,
        out_shape=jax.ShapeDtypeStruct((N, rows, Cout_pad), out_dtype),
        grid_spec=pltpu.PrefetchScalarGridSpec(
            num_scalar_prefetch=0,
            grid=grid,
            in_specs=[
                # One padded image per batch; constant over the Cout axis, so the
                # pipeline DMAs it from HBM exactly once per batch.
                pl.BlockSpec((1, s * s, L_pad, Cin), lambda n, cn: (n, 0, 0, 0)),
                # BN-folded weight taps, streamed per Cout tile (resident when
                # grid_n == 1: unchanged block index => no re-fetch).
                pl.BlockSpec((kh * kw, Cin, tile_n), lambda n, cn: (0, 0, cn)),
                pl.BlockSpec((1, tile_n), lambda n, cn: (0, cn)),
            ],
            out_specs=pl.BlockSpec((1, rows, tile_n), lambda n, cn: (n, 0, cn)),
        ),
        compiler_params=pltpu.CompilerParams(
            dimension_semantics=("parallel", "parallel"),
            vmem_limit_bytes=vmem_limit),
        cost_estimate=cost,
    )(xps, w_taps, shift_row)

    out = out.reshape(N, Ho, Ws, Cout_pad)           # metadata-only reshape
    if Ws != Wo:
        out = out[:, :, :Wo, :]                      # drop row-pitch padding columns
    if not keep_channel_padding and Cout_pad != Cout:
        out = out[..., :Cout]                        # padded channels are exactly zero
    if output_format == "NCHW":
        out = jnp.transpose(out, (0, 3, 1, 2))
    elif output_format != "NHWC":
        raise ValueError(output_format)
    return out


def _reference_f32(x, w, gamma, beta, mean, var, *, stride, padding, eps=1e-5):
    y = lax.conv_general_dilated(
        x, w, window_strides=(stride, stride),
        padding=[(padding, padding), (padding, padding)],
        dimension_numbers=("NCHW", "OIHW", "NCHW"),
        precision=lax.Precision.HIGHEST)
    inv_std = 1.0 / jnp.sqrt(var + eps)
    scale = (gamma * inv_std)[None, :, None, None]
    shift = (beta - mean * gamma * inv_std)[None, :, None, None]
    return jnp.maximum(y * scale + shift, 0.0)


def _reference_bf16(x, w, gamma, beta, mean, var, *, stride, padding, eps=1e-5):
    # Same rounding points as the kernel: bf16 input, bf16 scale-folded weights,
    # f32 accumulation, f32 shift add, bf16 output.
    inv_std = 1.0 / jnp.sqrt(var + eps)
    scale = gamma * inv_std
    shift = (beta - mean * scale)[None, :, None, None]
    xb = x.astype(jnp.bfloat16).astype(jnp.float32)
    wb = (w * scale[:, None, None, None]).astype(jnp.bfloat16).astype(jnp.float32)
    y = lax.conv_general_dilated(
        xb, wb, window_strides=(stride, stride),
        padding=[(padding, padding), (padding, padding)],
        dimension_numbers=("NCHW", "OIHW", "NCHW"),
        precision=lax.Precision.HIGHEST)
    return jnp.maximum(y + shift, 0.0).astype(jnp.bfloat16).astype(jnp.float32)


if __name__ == "__main__":
    # BasicConv2d(in_planes=4, out_planes=8, kernel_size=3, stride=1, padding=1)
    N, Cin, H, W = 2, 4, 16, 16
    Cout, kh, kw = 8, 3, 3
    stride, padding = 1, 1

    key = jax.random.PRNGKey(0)
    k_x, k_w, k_g, k_b, k_m, k_v = jax.random.split(key, 6)
    x = jax.random.normal(k_x, (N, Cin, H, W), dtype=jnp.float32)
    weight = jax.random.normal(k_w, (Cout, Cin, kh, kw), dtype=jnp.float32) * 0.1
    gamma = jax.random.uniform(k_g, (Cout,), jnp.float32, 0.5, 1.5)
    beta = jax.random.normal(k_b, (Cout,), dtype=jnp.float32) * 0.1
    running_mean = jax.random.normal(k_m, (Cout,), dtype=jnp.float32) * 0.1
    running_var = jax.random.uniform(k_v, (Cout,), jnp.float32, 0.5, 1.5)

    fwd = jax.jit(functools.partial(basic_conv2d, stride=stride, padding=padding))
    out = jax.block_until_ready(fwd(x, weight, gamma, beta, running_mean, running_var))
    assert out.shape == (N, Cout, H, W), out.shape
    assert out.dtype == jnp.bfloat16, out.dtype
    out_f32 = out.astype(jnp.float32)

    ref_tight = _reference_bf16(x, weight, gamma, beta, running_mean, running_var,
                                stride=stride, padding=padding)
    ref_loose = _reference_f32(x, weight, gamma, beta, running_mean, running_var,
                               stride=stride, padding=padding)
    assert jnp.allclose(out_f32, ref_tight, rtol=2e-2, atol=2e-2), \
        float(jnp.max(jnp.abs(out_f32 - ref_tight)))
    assert jnp.allclose(out_f32, ref_loose, rtol=6e-2, atol=6e-2), \
        float(jnp.max(jnp.abs(out_f32 - ref_loose)))
    print("KERNEL_OK")
</pallas_src>

<mosaic_0001>
module attributes {stable_mosaic.version = 11 : i64} {
  func.func @_conv_bn_relu_kernel(%arg0: i32, %arg1: i32, %arg2: memref<1x1x328x4xbf16, #tpu.memory_space<vmem>>, %arg3: memref<9x4x128xbf16, #tpu.memory_space<vmem>>, %arg4: memref<1x128xf32, #tpu.memory_space<vmem>>, %arg5: memref<1x288x128xbf16, #tpu.memory_space<vmem>>) attributes {dimension_semantics = [#tpu.dimension_semantics<parallel>, #tpu.dimension_semantics<parallel>], iteration_bounds = array<i64: 2, 1>, scalar_prefetch = 0 : i64, scratch_operands = 0 : i64, tpu.core_type = #tpu.core_type<tc>, window_params = [{transform_indices = @transform_0, window_bounds = array<i64: 1, 1, 328, 4>}, {transform_indices = @transform_1, window_bounds = array<i64: 9, 4, 128>}, {transform_indices = @transform_2, window_bounds = array<i64: 1, 128>}, {transform_indices = @transform_3, window_bounds = array<i64: 1, 288, 128>}]} {
    %cst = arith.constant 0.000000e+00 : f32
    %0 = vector.broadcast %cst : f32 to vector<288x128xf32>
    %c0 = arith.constant 0 : index
    %c0_0 = arith.constant 0 : index
    %c0_1 = arith.constant 0 : index
    %c0_2 = arith.constant 0 : index
    %1 = vector.load %arg2[%c0, %c0_0, %c0_1, %c0_2] : memref<1x1x328x4xbf16, #tpu.memory_space<vmem>>, vector<1x1x288x4xbf16>
    %2 = vector.shape_cast %1 : vector<1x1x288x4xbf16> to vector<288x4xbf16>
    %c0_3 = arith.constant 0 : index
    %c0_4 = arith.constant 0 : index
    %c0_5 = arith.constant 0 : index
    %3 = vector.load %arg3[%c0_3, %c0_4, %c0_5] : memref<9x4x128xbf16, #tpu.memory_space<vmem>>, vector<1x4x128xbf16>
    %4 = vector.shape_cast %3 : vector<1x4x128xbf16> to vector<4x128xbf16>
    %cst_6 = arith.constant dense<0.000000e+00> : vector<288x128xf32>
    %5 = tpu.matmul %2, %4, %cst_6 {dimension_numbers = #tpu.dot_dimension_numbers<[1], [0], [0], [1], [0, 0, 1, 1], [], []>} : vector<288x4xbf16>, vector<4x128xbf16>, vector<288x128xf32> -> vector<288x128xf32>
    %6 = arith.addf %0, %5 : vector<288x128xf32>
    %c0_7 = arith.constant 0 : index
    %c0_8 = arith.constant 0 : index
    %c1 = arith.constant 1 : index
    %c0_9 = arith.constant 0 : index
    %7 = vector.load %arg2[%c0_7, %c0_8, %c1, %c0_9] : memref<1x1x328x4xbf16, #tpu.memory_space<vmem>>, vector<1x1x288x4xbf16>
    %8 = vector.shape_cast %7 : vector<1x1x288x4xbf16> to vector<288x4xbf16>
    %c1_10 = arith.constant 1 : index
    %c0_11 = arith.constant 0 : index
    %c0_12 = arith.constant 0 : index
    %9 = vector.load %arg3[%c1_10, %c0_11, %c0_12] : memref<9x4x128xbf16, #tpu.memory_space<vmem>>, vector<1x4x128xbf16>
    %10 = vector.shape_cast %9 : vector<1x4x128xbf16> to vector<4x128xbf16>
    %cst_13 = arith.constant dense<0.000000e+00> : vector<288x128xf32>
    %11 = tpu.matmul %8, %10, %cst_13 {dimension_numbers = #tpu.dot_dimension_numbers<[1], [0], [0], [1], [0, 0, 1, 1], [], []>} : vector<288x4xbf16>, vector<4x128xbf16>, vector<288x128xf32> -> vector<288x128xf32>
    %12 = arith.addf %6, %11 : vector<288x128xf32>
    %c0_14 = arith.constant 0 : index
    %c0_15 = arith.constant 0 : index
    %c2 = arith.constant 2 : index
    %c0_16 = arith.constant 0 : index
    %13 = vector.load %arg2[%c0_14, %c0_15, %c2, %c0_16] : memref<1x1x328x4xbf16, #tpu.memory_space<vmem>>, vector<1x1x288x4xbf16>
    %14 = vector.shape_cast %13 : vector<1x1x288x4xbf16> to vector<288x4xbf16>
    %c2_17 = arith.constant 2 : index
    %c0_18 = arith.constant 0 : index
    %c0_19 = arith.constant 0 : index
    %15 = vector.load %arg3[%c2_17, %c0_18, %c0_19] : memref<9x4x128xbf16, #tpu.memory_space<vmem>>, vector<1x4x128xbf16>
    %16 = vector.shape_cast %15 : vector<1x4x128xbf16> to vector<4x128xbf16>
    %cst_20 = arith.constant dense<0.000000e+00> : vector<288x128xf32>
    %17 = tpu.matmul %14, %16, %cst_20 {dimension_numbers = #tpu.dot_dimension_numbers<[1], [0], [0], [1], [0, 0, 1, 1], [], []>} : vector<288x4xbf16>, vector<4x128xbf16>, vector<288x128xf32> -> vector<288x128xf32>
    %18 = arith.addf %12, %17 : vector<288x128xf32>
    %c0_21 = arith.constant 0 : index
    %c0_22 = arith.constant 0 : index
    %c18 = arith.constant 18 : index
    %c0_23 = arith.constant 0 : index
    %19 = vector.load %arg2[%c0_21, %c0_22, %c18, %c0_23] : memref<1x1x328x4xbf16, #tpu.memory_space<vmem>>, vector<1x1x288x4xbf16>
    %20 = vector.shape_cast %19 : vector<1x1x288x4xbf16> to vector<288x4xbf16>
    %c3 = arith.constant 3 : index
    %c0_24 = arith.constant 0 : index
    %c0_25 = arith.constant 0 : index
    %21 = vector.load %arg3[%c3, %c0_24, %c0_25] : memref<9x4x128xbf16, #tpu.memory_space<vmem>>, vector<1x4x128xbf16>
    %22 = vector.shape_cast %21 : vector<1x4x128xbf16> to vector<4x128xbf16>
    %cst_26 = arith.constant dense<0.000000e+00> : vector<288x128xf32>
    %23 = tpu.matmul %20, %22, %cst_26 {dimension_numbers = #tpu.dot_dimension_numbers<[1], [0], [0], [1], [0, 0, 1, 1], [], []>} : vector<288x4xbf16>, vector<4x128xbf16>, vector<288x128xf32> -> vector<288x128xf32>
    %24 = arith.addf %18, %23 : vector<288x128xf32>
    %c0_27 = arith.constant 0 : index
    %c0_28 = arith.constant 0 : index
    %c19 = arith.constant 19 : index
    %c0_29 = arith.constant 0 : index
    %25 = vector.load %arg2[%c0_27, %c0_28, %c19, %c0_29] : memref<1x1x328x4xbf16, #tpu.memory_space<vmem>>, vector<1x1x288x4xbf16>
    %26 = vector.shape_cast %25 : vector<1x1x288x4xbf16> to vector<288x4xbf16>
    %c4 = arith.constant 4 : index
    %c0_30 = arith.constant 0 : index
    %c0_31 = arith.constant 0 : index
    %27 = vector.load %arg3[%c4, %c0_30, %c0_31] : memref<9x4x128xbf16, #tpu.memory_space<vmem>>, vector<1x4x128xbf16>
    %28 = vector.shape_cast %27 : vector<1x4x128xbf16> to vector<4x128xbf16>
    %cst_32 = arith.constant dense<0.000000e+00> : vector<288x128xf32>
    %29 = tpu.matmul %26, %28, %cst_32 {dimension_numbers = #tpu.dot_dimension_numbers<[1], [0], [0], [1], [0, 0, 1, 1], [], []>} : vector<288x4xbf16>, vector<4x128xbf16>, vector<288x128xf32> -> vector<288x128xf32>
    %30 = arith.addf %24, %29 : vector<288x128xf32>
    %c0_33 = arith.constant 0 : index
    %c0_34 = arith.constant 0 : index
    %c20 = arith.constant 20 : index
    %c0_35 = arith.constant 0 : index
    %31 = vector.load %arg2[%c0_33, %c0_34, %c20, %c0_35] : memref<1x1x328x4xbf16, #tpu.memory_space<vmem>>, vector<1x1x288x4xbf16>
    %32 = vector.shape_cast %31 : vector<1x1x288x4xbf16> to vector<288x4xbf16>
    %c5 = arith.constant 5 : index
    %c0_36 = arith.constant 0 : index
    %c0_37 = arith.constant 0 : index
    %33 = vector.load %arg3[%c5, %c0_36, %c0_37] : memref<9x4x128xbf16, #tpu.memory_space<vmem>>, vector<1x4x128xbf16>
    %34 = vector.shape_cast %33 : vector<1x4x128xbf16> to vector<4x128xbf16>
    %cst_38 = arith.constant dense<0.000000e+00> : vector<288x128xf32>
    %35 = tpu.matmul %32, %34, %cst_38 {dimension_numbers = #tpu.dot_dimension_numbers<[1], [0], [0], [1], [0, 0, 1, 1], [], []>} : vector<288x4xbf16>, vector<4x128xbf16>, vector<288x128xf32> -> vector<288x128xf32>
    %36 = arith.addf %30, %35 : vector<288x128xf32>
    %c0_39 = arith.constant 0 : index
    %c0_40 = arith.constant 0 : index
    %c36 = arith.constant 36 : index
    %c0_41 = arith.constant 0 : index
    %37 = vector.load %arg2[%c0_39, %c0_40, %c36, %c0_41] : memref<1x1x328x4xbf16, #tpu.memory_space<vmem>>, vector<1x1x288x4xbf16>
    %38 = vector.shape_cast %37 : vector<1x1x288x4xbf16> to vector<288x4xbf16>
    %c6 = arith.constant 6 : index
    %c0_42 = arith.constant 0 : index
    %c0_43 = arith.constant 0 : index
    %39 = vector.load %arg3[%c6, %c0_42, %c0_43] : memref<9x4x128xbf16, #tpu.memory_space<vmem>>, vector<1x4x128xbf16>
    %40 = vector.shape_cast %39 : vector<1x4x128xbf16> to vector<4x128xbf16>
    %cst_44 = arith.constant dense<0.000000e+00> : vector<288x128xf32>
    %41 = tpu.matmul %38, %40, %cst_44 {dimension_numbers = #tpu.dot_dimension_numbers<[1], [0], [0], [1], [0, 0, 1, 1], [], []>} : vector<288x4xbf16>, vector<4x128xbf16>, vector<288x128xf32> -> vector<288x128xf32>
    %42 = arith.addf %36, %41 : vector<288x128xf32>
    %c0_45 = arith.constant 0 : index
    %c0_46 = arith.constant 0 : index
    %c37 = arith.constant 37 : index
    %c0_47 = arith.constant 0 : index
    %43 = vector.load %arg2[%c0_45, %c0_46, %c37, %c0_47] : memref<1x1x328x4xbf16, #tpu.memory_space<vmem>>, vector<1x1x288x4xbf16>
    %44 = vector.shape_cast %43 : vector<1x1x288x4xbf16> to vector<288x4xbf16>
    %c7 = arith.constant 7 : index
    %c0_48 = arith.constant 0 : index
    %c0_49 = arith.constant 0 : index
    %45 = vector.load %arg3[%c7, %c0_48, %c0_49] : memref<9x4x128xbf16, #tpu.memory_space<vmem>>, vector<1x4x128xbf16>
    %46 = vector.shape_cast %45 : vector<1x4x128xbf16> to vector<4x128xbf16>
    %cst_50 = arith.constant dense<0.000000e+00> : vector<288x128xf32>
    %47 = tpu.matmul %44, %46, %cst_50 {dimension_numbers = #tpu.dot_dimension_numbers<[1], [0], [0], [1], [0, 0, 1, 1], [], []>} : vector<288x4xbf16>, vector<4x128xbf16>, vector<288x128xf32> -> vector<288x128xf32>
    %48 = arith.addf %42, %47 : vector<288x128xf32>
    %c0_51 = arith.constant 0 : index
    %c0_52 = arith.constant 0 : index
    %c38 = arith.constant 38 : index
    %c0_53 = arith.constant 0 : index
    %49 = vector.load %arg2[%c0_51, %c0_52, %c38, %c0_53] : memref<1x1x328x4xbf16, #tpu.memory_space<vmem>>, vector<1x1x288x4xbf16>
    %50 = vector.shape_cast %49 : vector<1x1x288x4xbf16> to vector<288x4xbf16>
    %c8 = arith.constant 8 : index
    %c0_54 = arith.constant 0 : index
    %c0_55 = arith.constant 0 : index
    %51 = vector.load %arg3[%c8, %c0_54, %c0_55] : memref<9x4x128xbf16, #tpu.memory_space<vmem>>, vector<1x4x128xbf16>
    %52 = vector.shape_cast %51 : vector<1x4x128xbf16> to vector<4x128xbf16>
    %cst_56 = arith.constant dense<0.000000e+00> : vector<288x128xf32>
    %53 = tpu.matmul %50, %52, %cst_56 {dimension_numbers = #tpu.dot_dimension_numbers<[1], [0], [0], [1], [0, 0, 1, 1], [], []>} : vector<288x4xbf16>, vector<4x128xbf16>, vector<288x128xf32> -> vector<288x128xf32>
    %54 = arith.addf %48, %53 : vector<288x128xf32>
    %c0_57 = arith.constant 0 : index
    %c0_58 = arith.constant 0 : index
    %55 = vector.load %arg4[%c0_57, %c0_58] : memref<1x128xf32, #tpu.memory_space<vmem>>, vector<1x128xf32>
    %56 = vector.broadcast %55 : vector<1x128xf32> to vector<288x128xf32>
    %57 = arith.addf %54, %56 : vector<288x128xf32>
    %cst_59 = arith.constant 0.000000e+00 : f32
    %58 = vector.broadcast %cst_59 : f32 to vector<288x128xf32>
    %59 = arith.maximumf %57, %58 : vector<288x128xf32>
    %60 = arith.truncf %59 : vector<288x128xf32> to vector<288x128xbf16>
    %c0_60 = arith.constant 0 : index
    %c0_61 = arith.constant 0 : index
    %c0_62 = arith.constant 0 : index
    %61 = vector.load %arg5[%c0_60, %c0_61, %c0_62] : memref<1x288x128xbf16, #tpu.memory_space<vmem>>, vector<1x288x128xbf16>
    %62 = vector.shape_cast %61 : vector<1x288x128xbf16> to vector<288x128xbf16>
    %63 = vector.shape_cast %60 : vector<288x128xbf16> to vector<1x288x128xbf16>
    tpu.vector_store %arg5[%c0_60, %c0_61, %c0_62], %63 {strides = array<i32>} : memref<1x288x128xbf16, #tpu.memory_space<vmem>>, vector<1x288x128xbf16>,
    return
  }
  func.func @transform_0(%arg0: i32, %arg1: i32) -> (i32, i32, i32, i32) {
    %c0_i32 = arith.constant 0 : i32
    %c0_i32_0 = arith.constant 0 : i32
    %c0_i32_1 = arith.constant 0 : i32
    %c0_i32_2 = arith.constant 0 : i32
    return %arg0, %c0_i32, %c0_i32_0, %c0_i32_1 : i32, i32, i32, i32
  }
  func.func @transform_1(%arg0: i32, %arg1: i32) -> (i32, i32, i32) {
    %c0_i32 = arith.constant 0 : i32
    %c0_i32_0 = arith.constant 0 : i32
    %c0_i32_1 = arith.constant 0 : i32
    return %c0_i32, %c0_i32_0, %arg1 : i32, i32, i32
  }
  func.func @transform_2(%arg0: i32, %arg1: i32) -> (i32, i32) {
    %c0_i32 = arith.constant 0 : i32
    %c0_i32_0 = arith.constant 0 : i32
    return %c0_i32, %arg1 : i32, i32
  }
  func.func @transform_3(%arg0: i32, %arg1: i32) -> (i32, i32, i32) {
    %c0_i32 = arith.constant 0 : i32
    %c0_i32_0 = arith.constant 0 : i32
    return %arg0, %c0_i32, %arg1 : i32, i32, i32
  }
}

</mosaic_0001>

<bundles_post_ra>
// kernel: basic_conv2d.1
= control target key start
LH: loop header
LB: loop body
LE: loop exit
PB: predicated region body
PF: predicated region fallthrough
CT: control target
= control target key end

     0   :  { %s5115_s12 = smov 0   ;;  %s5117_s13 = smov 0   ;;  %s6501_s0 = inlined_call_operand.vmem [shape: bf16[2,1,328,4], index: 0, kind: input, shape index: {}]   ;;  %s6502_s1 = inlined_call_operand.vmem [shape: bf16[9,4,128], index: 1, kind: input, shape index: {}]   ;;  %s6503_s2 = inlined_call_operand.vmem [shape: f32[1,128], index: 2, kind: input, shape index: {}]   ;;  %s6504_s3 = inlined_call_operand.vmem [shape: bf16[2,288,128], index: 3, kind: output, shape index: {}]  }
   0x1   :  { %s5119_s14 = smov 0  }
   0x2 LB: > { %s25_s15 = sadd.s32 1, %s5089_s13  ;;  %p4041_p0 = scmp.ge.s32.totalorder %s5093_s14, 1  ;;  %s5093_s14 = sphi %s5119_s14, %s13_s14   ;;  %s5089_s13 = sphi %s5117_s13, %s6544_s13   ;;  %s5085_s12 = sphi %s5115_s12, %s6543_s12  }
   0x3   : > { %p27_p1 = scmp.ge.s32.totalorder %s25_s15, 2  ;;  %p168_p2 = scmp.lt.s32.totalorder %s5093_s14, 3 }
   0x5   : > { %s6546_s15 = smov (%p27_p1, %s25_s15), 0  ;;  %p169_p3 = pnand %p4041_p0, %p168_p2 }
   0x7   : > { %172 = sbr.rel (%p169_p3) target bundleno = 557 (0x22d), region = 32 }
   0xc   : > { %v4044_v0 = vld [vmem:[%s6502_s1 + $0x2] sm:$0x3]  ;;  %vm560_vm0 = vcmask 1041408   ;;  %p202_p4 = scmp.lt.s32.totalorder %s5085_s12, 1  ;;  %v4100_v2 = vld [vmem:[%s6502_s1 + $0x4] sm:$0x3] }
   0xd   : > { %4973 = vmatprep.subr.msk.bf16.mxu0 %vm560_vm0, %v4044_v0  ;;  %4974 = vmatprep.subr.msk.bf16.mxu1 %vm560_vm0, %v4044_v0  ;;  %v562_v1 = vsel %vm560_vm0, %v4044_v0, 0  ;;  %v259_v3 = vld [vmem:[%s6502_s1] sm:$0x3]  ;;  %vm356_vm1 = vsmask.f32 7424  ;;  %vm505_vm2 = vcmask 31744  }
   0xe   : > { %4630 = vmatpush3.bf16.msra.mxu0 %v562_v1  ;;  %4972 = vmatpush3.bf16.msra.mxu1 %v562_v1  ;;  %s6548_s12 = smov (!%p202_p4, %s5085_s12), 1  ;;  %v1056_v8 = vsel %vm560_vm0, %v4100_v2, 0  ;;  %v778_v16 = vsel %vm560_vm0, %v259_v3, 0  ;;  %v5198_v33 = vld [vmem:[%s6502_s1 + $0x8] sm:$0x3]  ;;  %vm963_vm3 = vcmask 1046528  }
   0xf   : > { %4976 = vmatprep.subr.msk.bf16.mxu0 %vm560_vm0, %v4100_v2  ;;  %4975 = vmatprep.subr.msk.bf16.mxu1 %vm560_vm0, %v259_v3  ;;  %s4983_s22 = smul.u32 164, %s6548_s12  ;;  %v5218_v45 = vld [vmem:[%s6502_s1 + $0x6] sm:$0x3]  ;;  %vm2163_vm4 = vcmask 1045504   ;;  %vm1716_vm5 = vsmask.f32 6400 }
  0x10   : > { %vm3363_vm6 = vcmask 1044480   ;;  %vm2916_vm7 = vsmask.f32 5376  ;;  %s4984_s17 = smul.u32 144, %s6548_s12 }
  0x11   : > { %s5153_s25 = scalar_lea.vmem %s6501_s0, %s4983_s22 }
  0x12   : > { %v223_v4 = vld [vmem:[%s5153_s25] sm:$0xf]  ;;  %v5157_v5 = vld [vmem:[%s5153_s25 + $0x4] sm:$0xf]  ;;  %v5163_v7 = vld [vmem:[%s5153_s25 + $0x8] sm:$0xff]   ;;  %s6410_s12 = scalar_lea.vmem %s6504_s3, %s4984_s17 }
  0x13   : > { %v5160_v6 = vcombine.low %v223_v4, %v5157_v5  ;;  %v365_v11 = vshll.u32 %v5163_v7, 16  ;;  %v369_v12 = vshrl.u32 %v5163_v7, 16  ;;  %v5171_v13 = vld [vmem:[%s5153_s25 + $0x50] sm:$0xff]   ;;  %v5174_v14 = vld [vmem:[%s5153_s25 + $0x58] sm:$0xff]   ;;  %v5186_v24 = vld [vmem:[%s5153_s25 + $0x60] sm:$0xff]  }
  0x14   : > { %v5177_v15 = vld [vmem:[%s5153_s25 + $0x10] sm:$0xff]   ;;  %v437_v19 = vshll.u32 %v5171_v13, 16  ;;  %v441_v20 = vshrl.u32 %v5171_v13, 16  ;;  %v445_v21 = vshll.u32 %v5174_v14, 16  ;;  %v449_v22 = vshrl.u32 %v5174_v14, 16  ;;  %v5191_v28 = vld [vmem:[%s5153_s25 + $0x18] sm:$0xff]  }
  0x15   : > { %v358_v9 = vshrl.u32 %v5160_v6, 16  ;;  %v360_v10 = vshll.u32 %v5160_v6, 16  ;;  %v367_v18 = vrot.slane %v365_v11, 1  ;;  %v373_v23 = vshll.u32 %v5177_v15, 16  ;;  %v5204_v37 = vld [vmem:[%s5153_s25 + $0x68] sm:$0xff]   ;;  %v5208_v39 = vld [vmem:[%s5153_s25 + $0x20] sm:$0xff]  }
  0x16   : > { %v5188_v27 = vrot.slane %v437_v19, 1  ;;  %v447_v29 = vrot.slane %v445_v21, 1  ;;  %v453_v31 = vshll.u32 %v5186_v24, 16  ;;  %v377_v32 = vshrl.u32 %v5177_v15, 16  ;;  %v5213_v44 = vld [vmem:[%s5153_s25 + $0x70] sm:$0xff]   ;;  %v5225_v50 = vld [vmem:[%s5153_s25 + $0x28] sm:$0xff]  }
  0x17   : > { %v362_v17 = vrot.slane %v360_v10, 1  ;;  %v371_v26 = vor.u32 %v369_v12, %v367_v18  ;;  %v375_v30 = vrot.slane %v373_v23, 1  ;;  %v381_v36 = vshll.u32 %v5191_v28, 16  ;;  %v5240_v62 = vld [vmem:[%s5153_s25 + $0x78] sm:$0xff]   ;;  %v5250_v10 = vld [vmem:[%s5153_s25 + $0x30] sm:$0xff]   ;;  %v5253_v11 = vld [vmem:[%s5153_s25 + $0x80] sm:$0xff]  }
  0x18   : > { %v443_v35 = vor.u32 %v441_v20, %v5188_v27  ;;  %v457_v38 = vshrl.u32 %v5186_v24, 16  ;;  %v451_v40 = vor.u32 %v449_v22, %v447_v29  ;;  %v455_v42 = vrot.slane %v453_v31, 1  ;;  %v5262_v23 = vld [vmem:[%s5153_s25 + $0x38] sm:$0xff]  }
  0x19   : > { %v363_v25 = vor.u32 %v362_v17, %v358_v9  ;;  %v376_v41 = vsel %vm356_vm1, %v371_v26, %v375_v30  ;;  %v379_v43 = vor.u32 %v377_v32, %v375_v30  ;;  %v383_v47 = vrot.slane %v381_v36, 1  ;;  %v5267_v26 = vld [vmem:[%s5153_s25 + $0x88] sm:$0xff]  }
  0x1a   : > { %v448_v46 = vsel %vm356_vm1, %v443_v35, %v447_v29  ;;  %v461_v48 = vshll.u32 %v5204_v37, 16  ;;  %v385_v49 = vshrl.u32 %v5191_v28, 16  ;;  %v456_v51 = vsel %vm356_vm1, %v451_v40, %v455_v42  ;;  %v5279_v40 = vld [vmem:[%s5153_s25 + $0x48] sm:$0xff]  }
  0x1b   : > { %v368_v34 = vsel %vm356_vm1, %v363_v25, %v367_v18  ;;  %4651 = vmatprep.mubr.msk.bf16.mxu1 %vm505_vm2, %v448_v46  ;;  %v459_v52 = vor.u32 %v457_v38, %v455_v42  ;;  %v389_v53 = vshll.u32 %v5208_v39, 16  ;;  %v465_v54 = vshrl.u32 %v5204_v37, 16  ;;  %v5276_v38 = vld [vmem:[%s5153_s25 + $0x40] sm:$0xff]  }
  0x1c   : > { %4631 = vmatprep.mubr.msk.bf16.mxu0 %vm505_vm2, %v368_v34  ;;  %4652 = vmatmul.mubr.msk.bf16.vlgmr.msra.gmra.mxu1 %vm505_vm2, %v456_v51  ;;  %v384_v55 = vsel %vm356_vm1, %v379_v43, %v383_v47  ;;  %v463_v56 = vrot.slane %v461_v48, 1  ;;  %v387_v57 = vor.u32 %v385_v49, %v383_v47  ;;  %v469_v58 = vshll.u32 %v5213_v44, 16  ;;  %v5026_v43 = vld [vmem:[%s5153_s25 + $0x90] ss:$0 sps:$4 sm:$0x11]  }
  0x1d   : > { %4632 = vmatmul.mubr.msk.bf16.vlgmr.msra.gmra.mxu0 %vm505_vm2, %v376_v41  ;;  %4668 = vmatpush3.bf16.msra.mxu1 %v778_v16  ;;  %v391_v59 = vrot.slane %v389_v53, 1  ;;  %v393_v60 = vshrl.u32 %v5208_v39, 16  ;;  %v397_v61 = vshll.u32 %v5225_v50, 16  ;;  %v473_v2 = vshrl.u32 %v5213_v44, 16 }
  0x1e   : > { %4706 = vmatpush3.bf16.msra.mxu0 %v1056_v8  ;;  %4635 = vmatprep.mubr.msk.bf16.mxu0 %vm505_vm2, %v384_v55  ;;  %v464_v63 = vsel %vm356_vm1, %v459_v52, %v463_v56  ;;  %v467_v0 = vor.u32 %v465_v54, %v463_v56  ;;  %v471_v1 = vrot.slane %v469_v58, 1  ;;  %v477_v9 = vshll.u32 %v5240_v62, 16 }
  0x1f   : > { %4978 = vmatprep.subr.msk.bf16.mxu0 %vm560_vm0, %v5198_v33  ;;  %4977 = vmatprep.subr.msk.bf16.mxu1 %vm560_vm0, %v5218_v45  ;;  %v392_v3 = vsel %vm356_vm1, %v387_v57, %v391_v59  ;;  %v395_v4 = vor.u32 %v393_v60, %v391_v59  ;;  %v399_v8 = vrot.slane %v397_v61, 1  ;;  %v401_v17 = vshrl.u32 %v5225_v50, 16 }
  0x20   : > { %4655 = vmatprep.mubr.msk.bf16.mxu1 %vm505_vm2, %v464_v63  ;;  %v472_v12 = vsel %vm356_vm1, %v467_v0, %v471_v1  ;;  %v475_v16 = vor.u32 %v473_v2, %v471_v1  ;;  %v481_v18 = vshrl.u32 %v5240_v62, 16  ;;  %v479_v20 = vrot.slane %v477_v9, 1  ;;  %v957_v63 = vld [vmem:[%s5153_s25] sm:$0xe] }
  0x21   : > { %v400_v19 = vsel %vm356_vm1, %v395_v4, %v399_v8  ;;  %v405_v21 = vshll.u32 %v5250_v10, 16  ;;  %v485_v22 = vshll.u32 %v5253_v11, 16  ;;  %v409_v25 = vshrl.u32 %v5250_v10, 16 }
  0x22   : > { %v480_v29 = vsel %vm356_vm1, %v475_v16, %v479_v20  ;;  %v403_v30 = vor.u32 %v401_v17, %v399_v8  ;;  %v413_v34 = vshll.u32 %v5262_v23, 16  ;;  %v489_v35 = vshrl.u32 %v5253_v11, 16 }
  0x23   : > { %v407_v31 = vrot.slane %v405_v21, 1  ;;  %v487_v32 = vrot.slane %v485_v22, 1  ;;  %v493_v36 = vshll.u32 %v5267_v26, 16  ;;  %v483_v41 = vor.u32 %v481_v18, %v479_v20 }
  0x24   : > { %4656 = vmatmul.mubr.msk.bf16.gmra.mxu1 %vm505_vm2, %v472_v12  ;;  %v415_v46 = vrot.slane %v413_v34, 1  ;;  %v421_v49 = vshll.u32 %v5276_v38, 16  ;;  %v417_v52 = vshrl.u32 %v5262_v23, 16  ;;  %v425_v54 = vshrl.u32 %v5276_v38, 16 }
  0x25   : > { %4636 = vmatmul.mubr.msk.bf16.gmra.mxu0 %vm505_vm2, %v392_v3  ;;  %4659 = vmatprep.mubr.msk.bf16.mxu1 %vm505_vm2, %v480_v29  ;;  %v411_v42 = vor.u32 %v409_v25, %v407_v31  ;;  %v491_v47 = vor.u32 %v489_v35, %v487_v32  ;;  %v495_v48 = vrot.slane %v493_v36, 1  ;;  %v408_v51 = vsel %vm356_vm1, %v403_v30, %v407_v31 }
  0x26   : > { %4639 = vmatprep.mubr.msk.bf16.mxu0 %vm505_vm2, %v400_v19  ;;  %v429_v55 = vshll.u32 %v5279_v40, 16  ;;  %v488_v56 = vsel %vm356_vm1, %v483_v41, %v487_v32  ;;  %v497_v57 = vshrl.u32 %v5267_v26, 16  ;;  %v501_v58 = vshll.u32 %v5026_v43, 16 }
  0x27   : > { %v416_v53 = vsel %vm356_vm1, %v411_v42, %v415_v46  ;;  %v496_v59 = vsel %vm356_vm1, %v491_v47, %v495_v48  ;;  %v423_v60 = vrot.slane %v421_v49, 1  ;;  %v419_v61 = vor.u32 %v417_v52, %v415_v46  ;;  %v5378_v46 = vld [vmem:[%s5153_s25 + $0x10] sm:$0xff]   ;;  %v5383_v49 = vld [vmem:[%s5153_s25 + $0x18] sm:$0xff]  }
  0x28   : > { %v431_v1 = vrot.slane %v429_v55, 1  ;;  %v499_v2 = vor.u32 %v497_v57, %v495_v48  ;;  %v503_v3 = vrot.slane %v501_v58, 1  ;;  %v433_v8 = vshrl.u32 %v5279_v40, 16  ;;  %v5396_v55 = vld [vmem:[%s5153_s25 + $0x30] sm:$0xff]  }
  0x29   : > { %v427_v0 = vor.u32 %v425_v54, %v423_v60  ;;  %v424_v4 = vsel %vm356_vm1, %v419_v61, %v423_v60  ;;  %v4101_v12 = vcombine.low %v957_v63, %v5157_v5  ;;  %v997_v17 = vrot.slane %v5267_v26, 1  ;;  %v5411_v61 = vld [vmem:[%s5153_s25 + $0x38] sm:$0xff]  }
  0x2a   : > { %v504_v16 = vsel %vm356_vm1, %v499_v2, %v503_v3  ;;  %v435_v18 = vor.u32 %v433_v8, %v431_v1  ;;  %v999_v19 = vrot.slane %v5026_v43, 1  ;;  %v965_v21 = vrot.slane %v5163_v7, 1  ;;  %v2157_v43 = vld [vmem:[%s5153_s25 + $0x8] sm:$0xc]  ;;  %v5421_v2 = vld [vmem:[%s5153_s25 + $0x40] sm:$0xff]  }
  0x2b   : > { %v432_v9 = vsel %vm356_vm1, %v427_v0, %v431_v1  ;;  %v964_v20 = vrot.slane %v4101_v12, 1  ;;  %v1495_v29 = vsel %vm560_vm0, %v5218_v45, 0  ;;  %v967_v30 = vrot.slane %v5177_v15, 1  ;;  %v5429_v8 = vld [vmem:[%s5153_s25 + $0x48] sm:$0xff]  }
  0x2c   : > { %4660 = vmatmul.mubr.msk.bf16.gmra.mxu1 %vm505_vm2, %v488_v56  ;;  %v5312_v5 = vsel %vm963_vm3, %v997_v17, %v999_v19  ;;  %v440_v22 = vsel %vm356_vm1, %v435_v18, %v5188_v27  ;;  %v969_v27 = vrot.slane %v5191_v28, 1  ;;  %v1942_v31 = vsel %vm560_vm0, %v5198_v33, 0 }
  0x2d   : > { %4640 = vmatmul.mubr.msk.bf16.gmra.mxu0 %vm505_vm2, %v408_v51  ;;  %4663 = vmatprep.mubr.msk.bf16.mxu1 %vm505_vm2, %v496_v59  ;;  %v966_v25 = vsel %vm963_vm3, %v964_v20, %v965_v21  ;;  %v968_v45 = vsel %vm963_vm3, %v965_v21, %v967_v30  ;;  %v973_v34 = vrot.slane %v5225_v50, 1  ;;  %v977_v36 = vrot.slane %v5262_v23, 1  ;;  %v5387_v51 = vld [vmem:[%s5153_s25 + $0x20] sm:$0xff]  }
  0x2e   : > { %4643 = vmatprep.mubr.msk.bf16.mxu0 %vm505_vm2, %v416_v53  ;;  %v970_v32 = vsel %vm963_vm3, %v967_v30, %v969_v27  ;;  %v979_v42 = vrot.slane %v5276_v38, 1  ;;  %v2165_v53 = vrot.slane %v5378_v46, 2  ;;  %v2167_v54 = vrot.slane %v5383_v49, 2  ;;  %v5459_v30 = vld [vmem:[%s5153_s25 + $0x58] sm:$0xff]  }
  0x2f   : > { %v2169_v57 = vrot.slane %v5387_v51, 2  ;;  %v983_v58 = vrot.slane %v5171_v13, 1  ;;  %v985_v59 = vrot.slane %v5174_v14, 1  ;;  %v2173_v1 = vrot.slane %v5396_v55, 2 }
  0x30   : > { %v980_v48 = vsel %vm963_vm3, %v977_v36, %v979_v42  ;;  %v5406_v60 = vsel %vm2163_vm4, %v2165_v53, %v2167_v54  ;;  %v2179_v18 = vrot.slane %v5429_v8, 2  ;;  %v987_v20 = vrot.slane %v5186_v24, 1 }
  0x31   : > { %v5414_v63 = vsel %vm2163_vm4, %v2167_v54, %v2169_v57 }
  0x34   : > { %4664 = vmatmul.mubr.msk.bf16.gmra.mxu1 %vm505_vm2, %v504_v16  ;;  %v2177_v16 = vrot.slane %v5421_v2, 2 }
  0x35   : > { %4644 = vmatmul.mubr.msk.bf16.gmra.mxu0 %vm505_vm2, %v424_v4  ;;  %4669 = vmatprep.mubr.msk.bf16.mxu1 %vm505_vm2, %v5160_v6  ;;  %v5325_v6 = vld [vmem:[%s6502_s1 + $0xa] sm:$0x3]  ;;  %v2175_v4 = vrot.slane %v5411_v61, 2 }
  0x36   : > { %4647 = vmatprep.mubr.msk.bf16.mxu0 %vm505_vm2, %v432_v9  ;;  %v5447_v21 = vsel %vm2163_vm4, %v2177_v16, %v2179_v18 }
  0x37   : > { %v5436_v12 = vsel %vm2163_vm4, %v2173_v1, %v2175_v4  ;;  %v5442_v19 = vsel %vm2163_vm4, %v2175_v4, %v2177_v16 }
  0x3c   : > { %4670 = vmatmul.mubr.msk.bf16.vlgmr.msra.gmra.mxu1 %vm505_vm2, %v5163_v7  ;;  %v5341_v7 = vld [vmem:[%s6502_s1 + $0xc] sm:$0x3] }
  0x3d   : > { %4648 = vmatmul.mubr.msk.bf16.gmra.mxu0 %vm505_vm2, %v440_v22  ;;  %4744 = vmatpush3.bf16.msra.mxu1 %v1495_v29  ;;  %v989_v22 = vrot.slane %v5204_v37, 1  ;;  %v988_v29 = vsel %vm963_vm3, %v985_v59, %v987_v20 }
  0x3e   : > { %4707 = vmatprep.mubr.msk.bf16.mxu0 %vm505_vm2, %v966_v25  ;;  %4673 = vmatprep.mubr.msk.bf16.mxu1 %vm505_vm2, %v5177_v15  ;;  %v971_v15 = vrot.slane %v5208_v39, 1  ;;  %v5455_v25 = vld [vmem:[%s5153_s25 + $0x50] sm:$0xff]  }
  0x3f   : > { %4979 = vmatprep.subr.msk.bf16.mxu1 %vm560_vm0, %v5325_v6 }
  0x40   : > { %v972_v33 = vsel %vm963_vm3, %v969_v27, %v971_v15  ;;  %v974_v35 = vsel %vm963_vm3, %v971_v15, %v973_v34  ;;  %v990_v27 = vsel %vm963_vm3, %v987_v20, %v989_v22  ;;  %v993_v15 = vrot.slane %v5240_v62, 1 }
  0x44   : > { %4674 = vmatmul.mubr.msk.bf16.gmra.mxu1 %vm505_vm2, %v5191_v28  ;;  %v975_v28 = vrot.slane %v5250_v10, 1 }
  0x45   : > { %4708 = vmatmul.mubr.msk.bf16.vlgmr.msra.gmra.mxu0 %vm505_vm2, %v968_v45  ;;  %4677 = vmatprep.mubr.msk.bf16.mxu1 %vm505_vm2, %v5208_v39  ;;  %v2181_v45 = vrot.slane %v5455_v25, 2 }
  0x46   : > { %4782 = vmatpush3.bf16.msra.mxu0 %v1942_v31  ;;  %4711 = vmatprep.mubr.msk.bf16.mxu0 %vm505_vm2, %v970_v32  ;;  %v976_v39 = vsel %vm963_vm3, %v973_v34, %v975_v28  ;;  %v978_v41 = vsel %vm963_vm3, %v975_v28, %v977_v36  ;;  %v1271_v34 = vld [vmem:[%s5153_s25 + $0x8] sm:$0xe] }
  0x47   : > { %4980 = vmatprep.subr.msk.bf16.mxu0 %vm560_vm0, %v5341_v7  ;;  %v5466_v31 = vsel %vm2163_vm4, %v2179_v18, %v2181_v45  ;;  %v5484_v28 = vld [vmem:[%s5153_s25 + $0x68] sm:$0xff]  }
  0x4c   : > { %4678 = vmatmul.mubr.msk.bf16.gmra.mxu1 %vm505_vm2, %v5225_v50  ;;  %v981_v50 = vrot.slane %v5279_v40, 1 }
  0x4d   : > { %4712 = vmatmul.mubr.msk.bf16.gmra.mxu0 %vm505_vm2, %v972_v33  ;;  %4681 = vmatprep.mubr.msk.bf16.mxu1 %vm505_vm2, %v5250_v10  ;;  %v5375_v10 = vld [vmem:[%s5153_s25 + $0xc] sm:$0xf]  ;;  %v5480_v33 = vld [vmem:[%s5153_s25 + $0x60] sm:$0xff]  }
  0x4e   : > { %4715 = vmatprep.mubr.msk.bf16.mxu0 %vm505_vm2, %v974_v35  ;;  %v4179_v47 = vcombine.low %v2157_v43, %v5375_v10 }
  0x50   : > { %v2164_v52 = vrot.slane %v4179_v47, 2  ;;  %v1726_v47 = vshrl.u32 %v5378_v46, 16 }
  0x52   : > { %v5399_v56 = vsel %vm2163_vm4, %v2164_v52, %v2165_v53  ;;  %v1404_v52 = vrot.slane %v5378_v46, 1  ;;  %v5507_v53 = vld [vmem:[%s5153_s25 + $0x70] sm:$0xff]  }
  0x53   : > { %v2189_v4 = vrot.slane %v5507_v53, 2 }
  0x54   : > { %4682 = vmatmul.mubr.msk.bf16.gmra.mxu1 %vm505_vm2, %v5262_v23  ;;  %v982_v23 = vsel %vm963_vm3, %v979_v42, %v981_v50  ;;  %v995_v42 = vrot.slane %v5253_v11, 1 }
  0x55   : > { %4716 = vmatmul.mubr.msk.bf16.gmra.mxu0 %vm505_vm2, %v976_v39  ;;  %4685 = vmatprep.mubr.msk.bf16.mxu1 %vm505_vm2, %v5276_v38  ;;  %v5391_v38 = vld [vmem:[%s5153_s25 + $0x28] sm:$0xff]   ;;  %v2185_v39 = vrot.slane %v5480_v33, 2 }
  0x56   : > { %4719 = vmatprep.mubr.msk.bf16.mxu0 %vm505_vm2, %v978_v41  ;;  %v2171_v0 = vrot.slane %v5391_v38, 2  ;;  %v4121_v41 = vcombine.low %v1271_v34, %v5375_v10  ;;  %v996_v54 = vsel %vm963_vm3, %v993_v15, %v995_v42  ;;  %v5540_v34 = vld [vmem:[%s5153_s25 + $0x88] sm:$0xff]  }
  0x58   : > { %v5424_v3 = vsel %vm2163_vm4, %v2169_v57, %v2171_v0  ;;  %v5432_v9 = vsel %vm2163_vm4, %v2171_v0, %v2173_v1  ;;  %v1718_v43 = vshrl.u32 %v4121_v41, 16  ;;  %v1721_v10 = vshll.u32 %v4121_v41, 16 }
  0x59   : > { %v998_v57 = vsel %vm963_vm3, %v995_v42, %v997_v17  ;;  %v1728_v0 = vrot.slane %v1726_v47, 1  ;;  %v1735_v17 = vshrl.u32 %v5383_v49, 16  ;;  %v1756_v47 = vshll.u32 %v5391_v38, 16 }
  0x5c   : > { %4686 = vmatmul.mubr.msk.bf16.gmra.mxu1 %vm505_vm2, %v5279_v40  ;;  %v984_v40 = vsel %vm963_vm3, %v981_v50, %v983_v58 }
  0x5d   : > { %4720 = vmatmul.mubr.msk.bf16.gmra.mxu0 %vm505_vm2, %v980_v48  ;;  %4689 = vmatprep.mubr.msk.bf16.mxu1 %vm505_vm2, %v5171_v13  ;;  %v986_v13 = vsel %vm963_vm3, %v983_v58, %v985_v59  ;;  %v1729_v48 = vshll.u32 %v5378_v46, 16  ;;  %v5514_v58 = vld [vmem:[%s5153_s25 + $0x78] sm:$0xff]   ;;  %v1723_v59 = vrot.slane %v1721_v10, 2  ;;  %v1753_v10 = vshrl.u32 %v5391_v38, 16 }
  0x5e   : > { %4723 = vmatprep.mubr.msk.bf16.mxu0 %vm505_vm2, %v982_v23  ;;  %v1403_v23 = vrot.slane %v4121_v41, 1 }
  0x5f   : > { %v1731_v1 = vrot.slane %v1729_v48, 2 }
  0x60   : > { %v1405_v46 = vsel %vm963_vm3, %v1403_v23, %v1404_v52  ;;  %v1762_v23 = vshrl.u32 %v5396_v55, 16 }
  0x61   : > { %v1732_v20 = vor.u32 %v1731_v1, %v1728_v0  ;;  %v2695_v0 = vsel %vm560_vm0, %v5341_v7, 0  ;;  %v1755_v1 = vrot.slane %v1753_v10, 1 }
  0x64   : > { %4690 = vmatmul.mubr.msk.bf16.gmra.mxu1 %vm505_vm2, %v5174_v14  ;;  %v2183_v14 = vrot.slane %v5459_v30, 2 }
  0x65   : > { %4724 = vmatmul.mubr.msk.bf16.gmra.mxu0 %vm505_vm2, %v984_v40  ;;  %4693 = vmatprep.mubr.msk.bf16.mxu1 %vm505_vm2, %v5186_v24  ;;  %v991_v24 = vrot.slane %v5213_v44, 1 }
  0x66   : > { %4727 = vmatprep.mubr.msk.bf16.mxu0 %vm505_vm2, %v986_v13  ;;  %v5471_v32 = vsel %vm2163_vm4, %v2181_v45, %v2183_v14  ;;  %v1738_v13 = vshll.u32 %v5383_v49, 16  ;;  %v1408_v45 = vrot.slane %v5387_v51, 1 }
  0x67   : > { %v992_v35 = vsel %vm963_vm3, %v989_v22, %v991_v24  ;;  %v994_v36 = vsel %vm963_vm3, %v991_v24, %v993_v15  ;;  %v1744_v22 = vshrl.u32 %v5387_v51, 16  ;;  %v1737_v24 = vrot.slane %v1735_v17, 1 }
  0x68   : > { %v1740_v15 = vrot.slane %v1738_v13, 2  ;;  %v1764_v17 = vrot.slane %v1762_v23, 1 }
  0x6c   : > { %4694 = vmatmul.mubr.msk.bf16.gmra.mxu1 %vm505_vm2, %v5204_v37  ;;  %v2187_v37 = vrot.slane %v5484_v28, 2 }
  0x6d   : > { %4728 = vmatmul.mubr.msk.bf16.gmra.mxu0 %vm505_vm2, %v988_v29  ;;  %4697 = vmatprep.mubr.msk.bf16.mxu1 %vm505_vm2, %v5213_v44  ;;  %v5492_v44 = vsel %vm2163_vm4, %v2183_v14, %v2185_v39  ;;  %v1747_v29 = vshll.u32 %v5387_v51, 16  ;;  %v5537_v14 = vld [vmem:[%s5153_s25 + $0x80] sm:$0xff]  }
  0x6e   : > { %4731 = vmatprep.mubr.msk.bf16.mxu0 %vm505_vm2, %v990_v27  ;;  %v5497_v50 = vsel %vm2163_vm4, %v2185_v39, %v2187_v37  ;;  %v5521_v40 = vsel %vm2163_vm4, %v2187_v37, %v2189_v4  ;;  %v1406_v27 = vrot.slane %v5383_v49, 1  ;;  %v2193_v39 = vrot.slane %v5537_v14, 2 }
  0x6f   : > { %v2195_v37 = vrot.slane %v5540_v34, 2  ;;  %v2256_v49 = vsel %vm560_vm0, %v5325_v6, 0 }
  0x70   : > { %v1407_v41 = vsel %vm963_vm3, %v1404_v52, %v1406_v27  ;;  %v1409_v51 = vsel %vm963_vm3, %v1406_v27, %v1408_v45  ;;  %v1765_v52 = vshll.u32 %v5396_v55, 16  ;;  %v1771_v27 = vshrl.u32 %v5411_v61, 16 }
  0x71   : > { %v5563_v6 = vsel %vm2163_vm4, %v2193_v39, %v2195_v37 }
  0x74   : > { %4698 = vmatmul.mubr.msk.bf16.gmra.mxu1 %vm505_vm2, %v5240_v62  ;;  %v1720_v62 = vrot.slane %v1718_v43, 1  ;;  %v1741_v43 = vor.u32 %v1740_v15, %v1737_v24 }
  0x75   : > { %4732 = vmatmul.mubr.msk.bf16.gmra.mxu0 %vm505_vm2, %v992_v35  ;;  %4701 = vmatprep.mubr.msk.bf16.mxu1 %vm505_vm2, %v5253_v11  ;;  %v2191_v11 = vrot.slane %v5514_v58, 2  ;;  %v1746_v35 = vrot.slane %v1744_v22, 1 }
  0x76   : > { %4735 = vmatprep.mubr.msk.bf16.mxu0 %vm505_vm2, %v994_v36  ;;  %v1724_v18 = vor.u32 %v1723_v59, %v1720_v62  ;;  %v1749_v36 = vrot.slane %v1747_v29, 2  ;;  %v5572_v62 = vld [vmem:[%s5153_s25 + $0x90] sm:$0xff]   ;;  %v1742_v59 = vsel %vm1716_vm5, %v1732_v20, %v1741_v43 }
  0x77   : > { %v5527_v16 = vsel %vm2163_vm4, %v2189_v4, %v2191_v11  ;;  %v5552_v42 = vsel %vm2163_vm4, %v2191_v11, %v2193_v39  ;;  %v1758_v4 = vrot.slane %v1756_v47, 2  ;;  %v5580_v11 = vld [vmem:[%s5153_s25 + $0x98] ss:$0 sps:$4 sm:$0x33]   ;;  %v1416_v39 = vrot.slane %v5421_v2, 1 }
  0x78   : > { %v1750_v48 = vor.u32 %v1749_v36, %v1746_v35  ;;  %v1783_v35 = vshll.u32 %v5421_v2, 16  ;;  %v1414_v36 = vrot.slane %v5411_v61, 1 }
  0x79   : > { %v1759_v29 = vor.u32 %v1758_v4, %v1755_v1  ;;  %v5625_v1 = vld [vmem:[%s5153_s25 + $0x14] sm:$0xf]  ;;  %v3357_v4 = vld [vmem:[%s5153_s25 + $0x10] sm:$0x8] }
  0x7a   : > { %v1785_v10 = vrot.slane %v1783_v35, 2  ;;  %v1417_v23 = vsel %vm963_vm3, %v1414_v36, %v1416_v39 }
  0x7c   : > { %4702 = vmatmul.mubr.msk.bf16.gmra.mxu1 %vm505_vm2, %v5267_v26  ;;  %v1733_v26 = vsel %vm1716_vm5, %v1724_v18, %v1732_v20  ;;  %v5588_v18 = vld [vmem:[%s6502_s1 + $0x10] sm:$0x3]  ;;  %v2199_v20 = vrot.slane %v5580_v11, 2 }
  0x7d   : > { %4736 = vmatmul.mubr.msk.bf16.gmra.mxu0 %vm505_vm2, %v996_v54  ;;  %4745 = vmatprep.mubr.msk.bf16.mxu1 %vm505_vm2, %v1405_v46  ;;  %v1410_v54 = vrot.slane %v5391_v38, 1  ;;  %v1751_v46 = vsel %vm1716_vm5, %v1741_v43, %v1750_v48  ;;  %v1767_v38 = vrot.slane %v1765_v52, 2 }
  0x7e   : > { %4739 = vmatprep.mubr.msk.bf16.mxu0 %vm505_vm2, %v998_v57  ;;  %v1412_v57 = vrot.slane %v5396_v55, 1  ;;  %v2197_v55 = vrot.slane %v5572_v62, 2 }
  0x7f   : > { %v1411_v13 = vsel %vm963_vm3, %v1408_v45, %v1410_v54  ;;  %v1774_v45 = vshll.u32 %v5411_v61, 16  ;;  %v1768_v15 = vor.u32 %v1767_v38, %v1764_v17 }
  0x80   : > { %v1413_v7 = vsel %vm963_vm3, %v1410_v54, %v1412_v57  ;;  %v5594_v22 = vsel %vm2163_vm4, %v2195_v37, %v2197_v55  ;;  %v5600_v24 = vsel %vm2163_vm4, %v2197_v55, %v2199_v20  ;;  %v1773_v37 = vrot.slane %v1771_v27, 1  ;;  %v5630_v55 = vld [vmem:[%s5153_s25 + $0x18] sm:$0xff]   ;;  %v5635_v27 = vld [vmem:[%s5153_s25 + $0x20] sm:$0xff]  }
  0x81   : > { %v1415_v47 = vsel %vm963_vm3, %v1412_v57, %v1414_v36  ;;  %v1798_v54 = vshrl.u32 %v5455_v25, 16  ;;  %v1801_v57 = vshll.u32 %v5455_v25, 16  ;;  %v1807_v36 = vshrl.u32 %v5459_v30, 16 }
  0x84   : > { %4746 = vmatmul.mubr.msk.bf16.vlgmr.msra.gmra.mxu1 %vm505_vm2, %v1407_v41  ;;  %v1760_v41 = vsel %vm1716_vm5, %v1750_v48, %v1759_v29  ;;  %v1792_v48 = vshll.u32 %v5429_v8, 16 }
  0x85   : > { %4740 = vmatmul.mubr.msk.bf16.gmra.mxu0 %vm505_vm2, %v5312_v5  ;;  %v5560_v5 = vld [vmem:[%s6502_s1 + $0xe] sm:$0x3]  ;;  %4820 = vmatpush3.bf16.msra.mxu1 %v2256_v49  ;;  %v1776_v49 = vrot.slane %v1774_v45, 2  ;;  %v3365_v45 = vrot.slane %v5630_v55, 3 }
  0x86   : > { %4783 = vmatprep.mubr.msk.bf16.mxu0 %vm505_vm2, %v1733_v26  ;;  %4749 = vmatprep.mubr.msk.bf16.mxu1 %vm505_vm2, %v1409_v51  ;;  %v1780_v26 = vshrl.u32 %v5421_v2, 16  ;;  %v1769_v51 = vsel %vm1716_vm5, %v1759_v29, %v1768_v15  ;;  %v1789_v2 = vshrl.u32 %v5429_v8, 16  ;;  %v1794_v38 = vrot.slane %v1792_v48, 2 }
  0x87   : > { %4981 = vmatprep.subr.msk.bf16.mxu1 %vm560_vm0, %v5560_v5  ;;  %v1777_v61 = vor.u32 %v1776_v49, %v1773_v37  ;;  %v1803_v29 = vrot.slane %v1801_v57, 2  ;;  %v1816_v49 = vshrl.u32 %v5480_v33, 16 }
  0x88   : > { %v1782_v43 = vrot.slane %v1780_v26, 1  ;;  %v1791_v17 = vrot.slane %v1789_v2, 1  ;;  %v6505_v26 = vrot.slane %v5635_v27, 3 }
  0x8a   : > { %v1786_v52 = vor.u32 %v1785_v10, %v1782_v43  ;;  %v1795_v35 = vor.u32 %v1794_v38, %v1791_v17  ;;  %v5654_v43 = vsel %vm3363_vm6, %v3365_v45, %v6505_v26  ;;  %v1422_v10 = vrot.slane %v5459_v30, 1 }
  0x8b   : > { %v1834_v17 = vshrl.u32 %v5507_v53, 16  ;;  %v1837_v38 = vshll.u32 %v5507_v53, 16 }
  0x8c   : > { %4750 = vmatmul.mubr.msk.bf16.gmra.mxu1 %vm505_vm2, %v1411_v13  ;;  %v4257_v13 = vcombine.low %v3357_v4, %v5625_v1  ;;  %v1787_v20 = vsel %vm1716_vm5, %v1777_v61, %v1786_v52 }
  0x8d   : > { %4784 = vmatmul.mubr.msk.bf16.vlgmr.msra.gmra.mxu0 %vm505_vm2, %v1742_v59  ;;  %4753 = vmatprep.mubr.msk.bf16.mxu1 %vm505_vm2, %v1413_v7  ;;  %v1418_v59 = vrot.slane %v5429_v8, 1  ;;  %v1800_v7 = vrot.slane %v1798_v54, 1  ;;  %v1818_v54 = vrot.slane %v1816_v49, 1  ;;  %v1855_v49 = vshll.u32 %v5537_v14, 16 }
  0x8e   : > { %4858 = vmatpush3.bf16.msra.mxu0 %v2695_v0  ;;  %4787 = vmatprep.mubr.msk.bf16.mxu0 %vm505_vm2, %v1751_v46  ;;  %v1420_v0 = vrot.slane %v5455_v25, 1  ;;  %v1778_v46 = vsel %vm1716_vm5, %v1768_v15, %v1777_v61  ;;  %v3364_v25 = vrot.slane %v4257_v13, 3  ;;  %v1809_v61 = vrot.slane %v1807_v36, 1 }
  0x8f   : > { %4982 = vmatprep.subr.msk.bf16.mxu0 %vm560_vm0, %v5588_v18  ;;  %v1419_v8 = vsel %vm963_vm3, %v1416_v39, %v1418_v59  ;;  %v1804_v39 = vor.u32 %v1803_v29, %v1800_v7  ;;  %v1428_v13 = vrot.slane %v5507_v53, 1  ;;  %v1846_v53 = vshll.u32 %v5514_v58, 16 }
  0x90   : > { %v1421_v15 = vsel %vm963_vm3, %v1418_v59, %v1420_v0  ;;  %v5646_v37 = vsel %vm3363_vm6, %v3364_v25, %v3365_v45  ;;  %v1423_v59 = vsel %vm963_vm3, %v1420_v0, %v1422_v10  ;;  %v1426_v0 = vrot.slane %v5484_v28, 1 }
  0x91   : > { %v1805_v48 = vsel %vm1716_vm5, %v1795_v35, %v1804_v39  ;;  %v1836_v25 = vrot.slane %v1834_v17, 1  ;;  %v1839_v45 = vrot.slane %v1837_v38, 2  ;;  %v1436_v17 = vrot.slane %v5572_v62, 1 }
  0x94   : > { %4754 = vmatmul.mubr.msk.bf16.gmra.mxu1 %vm505_vm2, %v1415_v47  ;;  %v1424_v47 = vrot.slane %v5480_v33, 1 }
  0x95   : > { %4788 = vmatmul.mubr.msk.bf16.gmra.mxu0 %vm505_vm2, %v1760_v41  ;;  %4757 = vmatprep.mubr.msk.bf16.mxu1 %vm505_vm2, %v1417_v23  ;;  %v1810_v41 = vshll.u32 %v5459_v30, 16  ;;  %v1796_v23 = vsel %vm1716_vm5, %v1786_v52, %v1795_v35  ;;  %v1825_v30 = vshrl.u32 %v5484_v28, 16  ;;  %v1429_v35 = vsel %vm963_vm3, %v1426_v0, %v1428_v13 }
  0x96   : > { %4791 = vmatprep.mubr.msk.bf16.mxu0 %vm505_vm2, %v1769_v51  ;;  %v1819_v51 = vshll.u32 %v5480_v33, 16  ;;  %v1425_v4 = vsel %vm963_vm3, %v1422_v10, %v1424_v47  ;;  %v1828_v33 = vshll.u32 %v5484_v28, 16  ;;  %v1843_v28 = vshrl.u32 %v5514_v58, 16 }
  0x97   : > { %v1812_v2 = vrot.slane %v1810_v41, 2  ;;  %v1827_v7 = vrot.slane %v1825_v30, 1  ;;  %v1840_v41 = vor.u32 %v1839_v45, %v1836_v25  ;;  %v1432_v10 = vrot.slane %v5537_v14, 1  ;;  %v5047_v25 = vld [vmem:[%s5153_s25 + $0x98] ss:$0 sps:$4 sm:$0x11]  }
  0x98   : > { %v1821_v57 = vrot.slane %v1819_v51, 2  ;;  %v1830_v29 = vrot.slane %v1828_v33, 2  ;;  %v1430_v51 = vrot.slane %v5514_v58, 1  ;;  %v1861_v58 = vshrl.u32 %v5540_v34, 16 }
  0x99   : > { %v1870_v30 = vshrl.u32 %v5572_v62, 16  ;;  %v1873_v33 = vshll.u32 %v5572_v62, 16  ;;  %v1879_v62 = vshrl.u32 %v5580_v11, 16 }
  0x9a   : > { %v1822_v52 = vor.u32 %v1821_v57, %v1818_v54  ;;  %v1831_v36 = vor.u32 %v1830_v29, %v1827_v7  ;;  %v1857_v54 = vrot.slane %v1855_v49, 2  ;;  %v1431_v57 = vsel %vm963_vm3, %v1428_v13, %v1430_v51 }
  0x9b   : > { %v1872_v7 = vrot.slane %v1870_v30, 1  ;;  %v1875_v29 = vrot.slane %v1873_v33, 2  ;;  %v5765_v30 = vld [vmem:[%s5153_s25 + $0x48] sm:$0xff]  }
  0x9c   : > { %4758 = vmatmul.mubr.msk.bf16.gmra.mxu1 %vm505_vm2, %v1419_v8 }
  0x9d   : > { %4792 = vmatmul.mubr.msk.bf16.gmra.mxu0 %vm505_vm2, %v1778_v46  ;;  %4761 = vmatprep.mubr.msk.bf16.mxu1 %vm505_vm2, %v1421_v15  ;;  %v1813_v46 = vor.u32 %v1812_v2, %v1809_v61  ;;  %v1427_v15 = vsel %vm963_vm3, %v1424_v47, %v1426_v0  ;;  %v1832_v47 = vsel %vm1716_vm5, %v1822_v52, %v1831_v36  ;;  %v1848_v61 = vrot.slane %v1846_v53, 2 }
  0x9e   : > { %4795 = vmatprep.mubr.msk.bf16.mxu0 %vm505_vm2, %v1787_v20  ;;  %v1841_v2 = vsel %vm1716_vm5, %v1831_v36, %v1840_v41  ;;  %v1863_v0 = vrot.slane %v1861_v58, 1  ;;  %v1438_v36 = vrot.slane %v5047_v25, 1  ;;  %v5749_v58 = vld [vmem:[%s5153_s25 + $0x38] sm:$0xff]  }
  0x9f   : > { %v1814_v20 = vsel %vm1716_vm5, %v1804_v39, %v1813_v46  ;;  %v1823_v8 = vsel %vm1716_vm5, %v1813_v46, %v1822_v52  ;;  %v1852_v39 = vshrl.u32 %v5537_v14, 16  ;;  %v1864_v14 = vshll.u32 %v5540_v34, 16 }
  0xa0   : > { %v1434_v52 = vrot.slane %v5540_v34, 1 }
  0xa1   : > { %v1866_v13 = vrot.slane %v1864_v14, 2  ;;  %v5761_v14 = vld [vmem:[%s5153_s25 + $0x40] sm:$0xff]  }
  0xa2   : > { %v1437_v45 = vsel %vm963_vm3, %v1434_v52, %v1436_v17 }
  0xa3   : > { %v1867_v34 = vor.u32 %v1866_v13, %v1863_v0 }
  0xa4   : > { %4762 = vmatmul.mubr.msk.bf16.gmra.mxu1 %vm505_vm2, %v1423_v59  ;;  %v1433_v59 = vsel %vm963_vm3, %v1430_v51, %v1432_v10 }
  0xa5   : > { %4796 = vmatmul.mubr.msk.bf16.gmra.mxu0 %vm505_vm2, %v1796_v23  ;;  %4765 = vmatprep.mubr.msk.bf16.mxu1 %vm505_vm2, %v1425_v4  ;;  %v1845_v23 = vrot.slane %v1843_v28, 1  ;;  %v2471_v28 = vld [vmem:[%s5153_s25 + $0x10] sm:$0xc] }
  0xa6   : > { %4799 = vmatprep.mubr.msk.bf16.mxu0 %vm505_vm2, %v1805_v48  ;;  %v1854_v48 = vrot.slane %v1852_v39, 1  ;;  %v5716_v51 = vcombine.low %v2471_v28, %v5625_v1 }
  0xa7   : > { %v1849_v4 = vor.u32 %v1848_v61, %v1845_v23  ;;  %v2604_v23 = vrot.slane %v5630_v55, 2 }
  0xa8   : > { %v1858_v46 = vor.u32 %v1857_v54, %v1854_v48  ;;  %v3142_v48 = vsel %vm560_vm0, %v5560_v5, 0  ;;  %v2606_v54 = vrot.slane %v5635_v27, 2  ;;  %v3456_v5 = vsel %vm560_vm0, %v5588_v18, 0 }
  0xa9   : > { %v1850_v38 = vsel %vm1716_vm5, %v1840_v41, %v1849_v4  ;;  %v1881_v41 = vrot.slane %v1879_v62, 1 }
  0xaa   : > { %v1868_v53 = vsel %vm1716_vm5, %v1858_v46, %v1867_v34 }
  0xac   : > { %4766 = vmatmul.mubr.msk.bf16.gmra.mxu1 %vm505_vm2, %v1427_v15  ;;  %v1882_v15 = vshll.u32 %v5580_v11, 16 }
  0xad   : > { %4800 = vmatmul.mubr.msk.bf16.gmra.mxu0 %vm505_vm2, %v1814_v20  ;;  %4769 = vmatprep.mubr.msk.bf16.mxu1 %vm505_vm2, %v1429_v35  ;;  %v1859_v20 = vsel %vm1716_vm5, %v1849_v4, %v1858_v46  ;;  %v1876_v35 = vor.u32 %v1875_v29, %v1872_v7 }
  0xae   : > { %4803 = vmatprep.mubr.msk.bf16.mxu0 %vm505_vm2, %v1823_v8  ;;  %v1435_v8 = vsel %vm963_vm3, %v1432_v10, %v1434_v52  ;;  %v1884_v39 = vrot.slane %v1882_v15, 2  ;;  %v1439_v10 = vsel %vm963_vm3, %v1436_v17, %v1438_v36  ;;  %v2616_v17 = vrot.slane %v5765_v30, 2 }
  0xaf   : > { %v1877_v49 = vsel %vm1716_vm5, %v1867_v34, %v1876_v35 }
  0xb0   : > { %v1885_v11 = vor.u32 %v1884_v39, %v1881_v41 }
  0xb2   : > { %v1886_v1 = vsel %vm1716_vm5, %v1876_v35, %v1885_v11 }
  0xb4   : > { %4770 = vmatmul.mubr.msk.bf16.gmra.mxu1 %vm505_vm2, %v1431_v57  ;;  %v2607_v57 = vsel %vm2163_vm4, %v2604_v23, %v2606_v54 }
  0xb5   : > { %4804 = vmatmul.mubr.msk.bf16.gmra.mxu0 %vm505_vm2, %v1832_v47  ;;  %4773 = vmatprep.mubr.msk.bf16.mxu1 %vm505_vm2, %v1433_v59  ;;  %v2603_v47 = vrot.slane %v5716_v51, 2  ;;  %v5743_v59 = vld [vmem:[%s5153_s25 + $0x30] sm:$0xff]  }
  0xb6   : > { %4807 = vmatprep.mubr.msk.bf16.mxu0 %vm505_vm2, %v1841_v2  ;;  %v5729_v2 = vld [vmem:[%s5153_s25 + $0x28] sm:$0xff]  }
  0xb7   : > { %v2605_v61 = vsel %vm2163_vm4, %v2603_v47, %v2604_v23 }
  0xbc   : > { %4774 = vmatmul.mubr.msk.bf16.gmra.mxu1 %vm505_vm2, %v1435_v8  ;;  %v5795_v8 = vld [vmem:[%s5153_s25 + $0x58] sm:$0xff]  }
  0xbd   : > { %4808 = vmatmul.mubr.msk.bf16.gmra.mxu0 %vm505_vm2, %v1850_v38  ;;  %4777 = vmatprep.mubr.msk.bf16.mxu1 %vm505_vm2, %v1437_v45  ;;  %v2620_v15 = vrot.slane %v5795_v8, 2 }
  0xbe   : > { %4811 = vmatprep.mubr.msk.bf16.mxu0 %vm505_vm2, %v1859_v20  ;;  %v5787_v20 = vld [vmem:[%s5153_s25 + $0x50] sm:$0xff]  }
  0xbf   : > { %v2618_v45 = vrot.slane %v5787_v20, 2 }
  0xc1   : > { %v2619_v28 = vsel %vm2163_vm4, %v2616_v17, %v2618_v45 }
  0xc4   : > { %4778 = vmatmul.mubr.msk.bf16.gmra.mxu1 %vm505_vm2, %v1439_v10 }
  0xc5   : > { %4812 = vmatmul.mubr.msk.bf16.gmra.mxu0 %vm505_vm2, %v1868_v53  ;;  %4821 = vmatprep.mubr.msk.bf16.mxu1 %vm505_vm2, %v5399_v56  ;;  %v2608_v56 = vrot.slane %v5729_v2, 2  ;;  %v5819_v53 = vld [vmem:[%s5153_s25 + $0x60] sm:$0xff]  }
  0xc6   : > { %4815 = vmatprep.mubr.msk.bf16.mxu0 %vm505_vm2, %v1877_v49  ;;  %v5827_v49 = vld [vmem:[%s5153_s25 + $0x68] sm:$0xff]   ;;  %v2622_v11 = vrot.slane %v5819_v53, 2 }
  0xc7   : > { %v2609_v4 = vsel %vm2163_vm4, %v2606_v54, %v2608_v56 }
  0xc8   : > { %v2623_v54 = vsel %vm2163_vm4, %v2620_v15, %v2622_v11 }
  0xcc   : > { %4822 = vmatmul.mubr.msk.bf16.vlgmr.msra.gmra.mxu1 %vm505_vm2, %v5406_v60  ;;  %v2610_v60 = vrot.slane %v5743_v59, 2 }
  0xcd   : > { %4816 = vmatmul.mubr.msk.bf16.gmra.mxu0 %vm505_vm2, %v1886_v1  ;;  %4896 = vmatpush3.bf16.msra.mxu1 %v3142_v48  ;;  %v2624_v1 = vrot.slane %v5827_v49, 2 }
  0xce   : > { %4859 = vmatprep.mubr.msk.bf16.mxu0 %vm505_vm2, %v2605_v61  ;;  %4825 = vmatprep.mubr.msk.bf16.mxu1 %vm505_vm2, %v5414_v63  ;;  %v2612_v63 = vrot.slane %v5749_v58, 2  ;;  %v2611_v18 = vsel %vm2163_vm4, %v2608_v56, %v2610_v60  ;;  %v5851_v56 = vld [vmem:[%s5153_s25 + $0x70] sm:$0xff]  }
  0xd0   : > { %v2613_v46 = vsel %vm2163_vm4, %v2610_v60, %v2612_v63 }
  0xd4   : > { %4826 = vmatmul.mubr.msk.bf16.gmra.mxu1 %vm505_vm2, %v5424_v3  ;;  %v2614_v3 = vrot.slane %v5761_v14, 2 }
  0xd5   : > { %4860 = vmatmul.mubr.msk.bf16.vlgmr.msra.gmra.mxu0 %vm505_vm2, %v2607_v57  ;;  %4829 = vmatprep.mubr.msk.bf16.mxu1 %vm505_vm2, %v5432_v9 }
  0xd6   : > { %4934 = vmatpush3.bf16.msra.mxu0 %v3456_v5  ;;  %4863 = vmatprep.mubr.msk.bf16.mxu0 %vm505_vm2, %v2609_v4  ;;  %v2615_v13 = vsel %vm2163_vm4, %v2612_v63, %v2614_v3  ;;  %v5859_v4 = vld [vmem:[%s5153_s25 + $0x78] sm:$0xff]   ;;  %v2626_v63 = vrot.slane %v5851_v56, 2 }
  0xdc   : > { %v5772_v52 = vpop.f32.mrf.mxu1  ;;  %4830 = vmatmul.mubr.msk.bf16.gmra.mxu1 %vm505_vm2, %v5436_v12  ;;  %v2617_v12 = vsel %vm2163_vm4, %v2614_v3, %v2616_v17  ;;  %v2628_v3 = vrot.slane %v5859_v4, 2 }
  0xdd   : > { %v5767_v33 = vpop.f32.mrf.mxu0  ;;  %4864 = vmatmul.mubr.msk.bf16.gmra.mxu0 %vm505_vm2, %v2611_v18  ;;  %4833 = vmatprep.mubr.msk.bf16.mxu1 %vm505_vm2, %v5442_v19 }
  0xde   : > { %4867 = vmatprep.mubr.msk.bf16.mxu0 %vm505_vm2, %v2613_v46  ;;  %v5781_v38 = vpop.f32.mrf.mxu1 }
  0xdf   : > { %v5776_v9 = vpop.f32.mrf.mxu0 }
  0xe0   : > { %v5789_v7 = vpop.f32.mrf.mxu1 }
  0xe1   : > { %v5783_v0 = vpop.f32.mrf.mxu0 }
  0xe2   : > { %v5797_v25 = vpop.f32.mrf.mxu1 }
  0xe3   : > { %v5791_v29 = vpop.f32.mrf.mxu0 }
  0xe4   : > { %v5804_v34 = vpop.f32.mrf.mxu1  ;;  %4834 = vmatmul.mubr.msk.bf16.gmra.mxu1 %vm505_vm2, %v5447_v21  ;;  %v2621_v21 = vsel %vm2163_vm4, %v2618_v45, %v2620_v15  ;;  %v5883_v45 = vld [vmem:[%s5153_s25 + $0x80] sm:$0xff]  }
  0xe5   : > { %v5799_v19 = vpop.f32.mrf.mxu0  ;;  %4868 = vmatmul.mubr.msk.bf16.gmra.mxu0 %vm505_vm2, %v2615_v13  ;;  %4837 = vmatprep.mubr.msk.bf16.mxu1 %vm505_vm2, %v5466_v31  ;;  %6520 = vst [vmem:[#allocation10_spill] sm:$0xff] %v5883_v45 }
  0xe6   : > { %4871 = vmatprep.mubr.msk.bf16.mxu0 %vm505_vm2, %v2617_v12  ;;  %v5813_v35 = vpop.f32.mrf.mxu1  ;;  %v2627_v12 = vsel %vm2163_vm4, %v2624_v1, %v2626_v63 }
  0xe7   : > { %v5808_v62 = vpop.f32.mrf.mxu0 }
  0xe8   : > { %v5821_v41 = vpop.f32.mrf.mxu1 }
  0xe9   : > { %v5815_v36 = vpop.f32.mrf.mxu0  ;;  %6512 = vst [vmem:[#allocation2_spill] sm:$0xff] %v5821_v41 }
  0xea   : > { %v5829_v10 = vpop.f32.mrf.mxu1 }
  0xeb   : > { %v5823_v39 = vpop.f32.mrf.mxu0  ;;  %6513 = vst [vmem:[#allocation3_spill] sm:$0xff] %v5829_v10 }
  0xec   : > { %v5836_v47 = vpop.f32.mrf.mxu1  ;;  %4838 = vmatmul.mubr.msk.bf16.gmra.mxu1 %vm505_vm2, %v5471_v32  ;;  %v2625_v32 = vsel %vm2163_vm4, %v2622_v11, %v2624_v1 }
  0xed   : > { %v5831_v31 = vpop.f32.mrf.mxu0  ;;  %4872 = vmatmul.mubr.msk.bf16.gmra.mxu0 %vm505_vm2, %v2619_v28  ;;  %6514 = vst [vmem:[#allocation4_spill] sm:$0xff] %v5836_v47  ;;  %4841 = vmatprep.mubr.msk.bf16.mxu1 %vm505_vm2, %v5492_v44 }
  0xee   : > { %4875 = vmatprep.mubr.msk.bf16.mxu0 %vm505_vm2, %v2621_v21  ;;  %v5845_v61 = vpop.f32.mrf.mxu1  ;;  %v5891_v21 = vld [vmem:[%s5153_s25 + $0x88] sm:$0xff]  }
  0xef   : > { %v5840_v23 = vpop.f32.mrf.mxu0  ;;  %6515 = vst [vmem:[#allocation5_spill] sm:$0xff] %v5845_v61  ;;  %6522 = vst [vmem:[#allocation12_spill] sm:$0xff] %v5891_v21  ;;  %v5923_v61 = vld [vmem:[%s5153_s25 + $0x98] sm:$0xff]  }
  0xf0   : > { %v5853_v57 = vpop.f32.mrf.mxu1  ;;  %6524 = vst [vmem:[#allocation14_spill] sm:$0xff] %v5923_v61 }
  0xf1   : > { %v5847_v48 = vpop.f32.mrf.mxu0  ;;  %6516 = vst [vmem:[#allocation6_spill] sm:$0xff] %v5853_v57  ;;  %v5917_v57 = vld [vmem:[%s5153_s25 + $0x90] sm:$0xff]  }
  0xf2   : > { %v5861_v60 = vpop.f32.mrf.mxu1 }
  0xf3   : > { %v5855_v5 = vpop.f32.mrf.mxu0  ;;  %6517 = vst [vmem:[#allocation7_spill] sm:$0xff] %v5861_v60 }
  0xf4   : > { %v5868_v18 = vpop.f32.mrf.mxu1  ;;  %4842 = vmatmul.mubr.msk.bf16.gmra.mxu1 %vm505_vm2, %v5497_v50  ;;  %v2629_v50 = vsel %vm2163_vm4, %v2626_v63, %v2628_v3  ;;  %v2632_v63 = vrot.slane %v5891_v21, 2 }
  0xf5   : > { %v5863_v44 = vpop.f32.mrf.mxu0  ;;  %4876 = vmatmul.mubr.msk.bf16.gmra.mxu0 %vm505_vm2, %v2623_v54  ;;  %6518 = vst [vmem:[#allocation8_spill] sm:$0xff] %v5868_v18  ;;  %4845 = vmatprep.mubr.msk.bf16.mxu1 %vm505_vm2, %v5521_v40  ;;  %v2630_v40 = vrot.slane %v5883_v45, 2 }
  0xf6   : > { %4879 = vmatprep.mubr.msk.bf16.mxu0 %vm505_vm2, %v2625_v32  ;;  %v5877_v17 = vpop.f32.mrf.mxu1 }
  0xf7   : > { %v5872_v46 = vpop.f32.mrf.mxu0  ;;  %6519 = vst [vmem:[#allocation9_spill] sm:$0xff] %v5877_v17  ;;  %v2926_v17 = vshrl.u32 %v5630_v55, 16  ;;  %v2631_v60 = vsel %vm2163_vm4, %v2628_v3, %v2630_v40 }
  0xf8   : > { %v5885_v15 = vpop.f32.mrf.mxu1 }
  0xf9   : > { %v5879_v13 = vpop.f32.mrf.mxu0  ;;  %6521 = vst [vmem:[#allocation11_spill] sm:$0xff] %v5885_v15  ;;  %v2921_v15 = vshll.u32 %v5716_v51, 16 }
  0xfa   : > { %v5893_v11 = vpop.f32.mrf.mxu1 }
  0xfb   : > { %v5887_v28 = vpop.f32.mrf.mxu0  ;;  %6523 = vst [vmem:[#allocation13_spill] sm:$0xff] %v5893_v11  ;;  %v2923_v21 = vrot.slane %v2921_v15, 3 }
  0xfc   : > { %v4671_v1 = vpop.f32.mrf.mxu1  ;;  %4846 = vmatmul.mubr.msk.bf16.gmra.mxu1 %vm505_vm2, %v5527_v16  ;;  %v2929_v16 = vshll.u32 %v5630_v55, 16 }
  0xfd   : > { %v5895_v54 = vpop.f32.mrf.mxu0  ;;  %4880 = vmatmul.mubr.msk.bf16.gmra.mxu0 %vm505_vm2, %v2627_v12  ;;  %v823_v26 = vadd.f32 %v4671_v1, %v5767_v33  ;;  %4849 = vmatprep.mubr.msk.bf16.mxu1 %vm505_vm2, %v5552_v42  ;;  %v2633_v42 = vsel %vm2163_vm4, %v2630_v40, %v2632_v63  ;;  %v2634_v40 = vrot.slane %v5917_v57, 2 }
  0xfe   : > { %4883 = vmatprep.mubr.msk.bf16.mxu0 %vm505_vm2, %v2629_v50  ;;  %v814_v12 = vpop.f32.mrf.mxu1  ;;  %v2918_v50 = vshrl.u32 %v5716_v51, 16 }
  0xff   : > { %v5902_v32 = vpop.f32.mrf.mxu0  ;;  %v815_v18 = vadd.f32 %v814_v12, %v5776_v9  ;;  %v2928_v9 = vrot.slane %v2926_v17, 2  ;;  %v2931_v12 = vrot.slane %v2929_v16, 3 }
 0x100   : > { %v4672_v33 = vpop.f32.mrf.mxu1  ;;  %v2920_v55 = vrot.slane %v2918_v50, 2 }
 0x101   : > { %v5908_v11 = vpop.f32.mrf.mxu0  ;;  %v826_v47 = vadd.f32 %v4672_v33, %v5783_v0  ;;  %v2636_v33 = vrot.slane %v5923_v61, 2  ;;  %v2932_v16 = vor.u32 %v2931_v12, %v2928_v9 }
 0x102   : > { %v817_v51 = vpop.f32.mrf.mxu1  ;;  %v2924_v50 = vor.u32 %v2923_v21, %v2920_v55 }
 0x103   : > { %v5919_v1 = vpop.f32.mrf.mxu0  ;;  %v818_v3 = vadd.f32 %v817_v51, %v5791_v29  ;;  %v2938_v29 = vshll.u32 %v5635_v27, 16 }
 0x104   : > { %v4675_v41 = vpop.f32.mrf.mxu1  ;;  %4850 = vmatmul.mubr.msk.bf16.gmra.mxu1 %vm505_vm2, %v5563_v6  ;;  %v2944_v6 = vshrl.u32 %v5729_v2, 16 }
 0x105   : > { %v4709_v10 = vpop.f32.mrf.mxu0  ;;  %4884 = vmatmul.mubr.msk.bf16.gmra.mxu0 %vm505_vm2, %v2631_v60  ;;  %v839_v60 = vadd.f32 %v4675_v41, %v5799_v19  ;;  %4853 = vmatprep.mubr.msk.bf16.mxu1 %vm505_vm2, %v5594_v22  ;;  %v2635_v41 = vsel %vm2163_vm4, %v2632_v63, %v2634_v40  ;;  %v5068_v22 = vld [vmem:[%s5153_s25 + $0xa0] ss:$0 sps:$4 sm:$0x33]   ;;  %v2940_v9 = vrot.slane %v2938_v29, 3  ;;  %v2956_v29 = vshll.u32 %v5743_v59, 16 }
 0x106   : > { %v5928_v45 = vadd.f32 %v4709_v10, %v823_v26  ;;  %4887 = vmatprep.mubr.msk.bf16.mxu0 %vm505_vm2, %v2633_v42  ;;  %v2935_v26 = vshrl.u32 %v5635_v27, 16  ;;  %v830_v10 = vpop.f32.mrf.mxu1  ;;  %v2947_v42 = vshll.u32 %v5729_v2, 16 }
 0x107   : > { %v1092_v0 = vpop.f32.mrf.mxu0  ;;  %v831_v51 = vadd.f32 %v830_v10, %v5808_v62  ;;  %v2933_v62 = vsel %vm2916_vm7, %v2924_v50, %v2932_v16 }
 0x108   : > { %6525 = vst [vmem:[#allocation15_spill] sm:$0xff] %v5928_v45  ;;  %v5936_v17 = vadd.f32 %v1092_v0, %v815_v18  ;;  %v4676_v18 = vpop.f32.mrf.mxu1  ;;  %v2937_v55 = vrot.slane %v2935_v26, 2  ;;  %v2949_v63 = vrot.slane %v2947_v42, 3  ;;  %v2953_v26 = vshrl.u32 %v5743_v59, 16 }
 0x109   : > { %v4710_v15 = vpop.f32.mrf.mxu0  ;;  %v842_v45 = vadd.f32 %v4676_v18, %v5815_v36  ;;  %v2962_v42 = vshrl.u32 %v5749_v58, 16 }
 0x10a   : > { %6526 = vst [vmem:[#allocation16_spill] sm:$0xff] %v5936_v17  ;;  %v5945_v19 = vadd.f32 %v4710_v15, %v826_v47  ;;  %v2637_v17 = vsel %vm2163_vm4, %v2634_v40, %v2636_v33  ;;  %v833_v12 = vpop.f32.mrf.mxu1  ;;  %v2946_v47 = vrot.slane %v2944_v6, 2  ;;  %v2638_v40 = vrot.slane %v5068_v22, 2 }
 0x10b   : > { %v1095_v0 = vpop.f32.mrf.mxu0  ;;  %v834_v10 = vadd.f32 %v833_v12, %v5823_v39  ;;  %v2941_v39 = vor.u32 %v2940_v9, %v2937_v55  ;;  %v2958_v12 = vrot.slane %v2956_v29, 3 }
 0x10c   : > { %v5951_v21 = vadd.f32 %v1095_v0, %v818_v3  ;;  %v4679_v36 = vpop.f32.mrf.mxu1  ;;  %4854 = vmatmul.mubr.msk.bf16.gmra.mxu1 %vm505_vm2, %v5600_v24  ;;  %v2639_v18 = vsel %vm2163_vm4, %v2636_v33, %v2638_v40 }
 0x10d   : > { %v4713_v61 = vpop.f32.mrf.mxu0  ;;  %4888 = vmatmul.mubr.msk.bf16.gmra.mxu0 %vm505_vm2, %v2635_v41  ;;  %v855_v50 = vadd.f32 %v4679_v36, %v5831_v31  ;;  %4897 = vmatprep.mubr.msk.bf16.mxu1 %vm505_vm2, %v2933_v62  ;;  %v2965_v41 = vshll.u32 %v5749_v58, 16  ;;  %v2942_v9 = vsel %vm2916_vm7, %v2932_v16, %v2941_v39 }
 0x10e   : > { %v5956_v15 = vadd.f32 %v4713_v61, %v839_v60  ;;  %4891 = vmatprep.mubr.msk.bf16.mxu0 %vm505_vm2, %v2637_v17  ;;  %v846_v61 = vpop.f32.mrf.mxu1  ;;  %v2950_v17 = vor.u32 %v2949_v63, %v2946_v47 }
 0x10f   : > { %v1108_v3 = vpop.f32.mrf.mxu0  ;;  %v847_v24 = vadd.f32 %v846_v61, %v5840_v23  ;;  %v2967_v36 = vrot.slane %v2965_v41, 3 }
 0x110   : > { %v5964_v6 = vadd.f32 %v1108_v3, %v831_v51  ;;  %v4680_v0 = vpop.f32.mrf.mxu1  ;;  %v2955_v51 = vrot.slane %v2953_v26, 2  ;;  %v2951_v23 = vsel %vm2916_vm7, %v2941_v39, %v2950_v17  ;;  %v3369_v3 = vrot.slane %v5729_v2, 3 }
 0x111   : > { %v4714_v60 = vpop.f32.mrf.mxu0  ;;  %v858_v62 = vadd.f32 %v4680_v0, %v5847_v48  ;;  %v6527_v0 = vrot.slane %v5635_v27, 3 }
 0x112   : > { %v5970_v22 = vadd.f32 %v4714_v60, %v842_v45  ;;  %v849_v47 = vpop.f32.mrf.mxu1  ;;  %v2964_v45 = vrot.slane %v2962_v42, 2  ;;  %v2959_v16 = vor.u32 %v2958_v12, %v2955_v51  ;;  %v2980_v60 = vshrl.u32 %v5765_v30, 16 }
 0x113   : > { %v1111_v31 = vpop.f32.mrf.mxu0  ;;  %v850_v33 = vadd.f32 %v849_v47, %v5855_v5  ;;  %v2971_v5 = vshrl.u32 %v5761_v14, 16  ;;  %v2983_v42 = vshll.u32 %v5765_v30, 16 }
 0x114   : > { %v5974_v55 = vadd.f32 %v1111_v31, %v834_v10  ;;  %v4683_v48 = vpop.f32.mrf.mxu1  ;;  %4898 = vmatmul.mubr.msk.bf16.vlgmr.msra.gmra.mxu1 %vm505_vm2, %v2942_v9  ;;  %v3370_v31 = vsel %vm3363_vm6, %v6527_v0, %v3369_v3 }
 0x115   : > { %v4717_v63 = vpop.f32.mrf.mxu0  ;;  %4892 = vmatmul.mubr.msk.bf16.gmra.mxu0 %vm505_vm2, %v2639_v18  ;;  %v871_v26 = vadd.f32 %v4683_v48, %v5863_v44  ;;  %4901 = vmatprep.mubr.msk.bf16.mxu1 %vm505_vm2, %v2951_v23  ;;  %v2960_v18 = vsel %vm2916_vm7, %v2950_v17, %v2959_v16  ;;  %v2973_v9 = vrot.slane %v2971_v5, 2  ;;  %v3373_v48 = vrot.slane %v5749_v58, 3 }
 0x116   : > { %v5980_v40 = vadd.f32 %v4717_v63, %v855_v50  ;;  %4935 = vmatprep.mubr.msk.bf16.mxu0 %vm505_vm2, %v5646_v37  ;;  %v2974_v50 = vshll.u32 %v5761_v14, 16  ;;  %v862_v39 = vpop.f32.mrf.mxu1  ;;  %v2968_v37 = vor.u32 %v2967_v36, %v2964_v45  ;;  %v2985_v45 = vrot.slane %v2983_v42, 3 }
 0x117   : > { %v1124_v10 = vpop.f32.mrf.mxu0  ;;  %v863_v41 = vadd.f32 %v862_v39, %v5872_v46  ;;  %v2998_v39 = vshrl.u32 %v5795_v8, 16 }
 0x118   : > { %v5987_v29 = vadd.f32 %v1124_v10, %v847_v24  ;;  %v4684_v44 = vpop.f32.mrf.mxu1  ;;  %v2976_v47 = vrot.slane %v2974_v50, 3  ;;  %v2969_v46 = vsel %vm2916_vm7, %v2959_v16, %v2968_v37  ;;  %v2992_v10 = vshll.u32 %v5787_v20, 16 }
 0x119   : > { %v4718_v61 = vpop.f32.mrf.mxu0  ;;  %v874_v51 = vadd.f32 %v4684_v44, %v5879_v13  ;;  %v3371_v13 = vrot.slane %v5743_v59, 3 }
 0x11a   : > { %v5995_v2 = vadd.f32 %v4718_v61, %v858_v62  ;;  %v865_v63 = vpop.f32.mrf.mxu1  ;;  %v2982_v62 = vrot.slane %v2980_v60, 2  ;;  %v3001_v61 = vshll.u32 %v5795_v8, 16 }
 0x11b   : > { %v1127_v24 = vpop.f32.mrf.mxu0  ;;  %v866_v17 = vadd.f32 %v865_v63, %v5887_v28  ;;  %v2977_v28 = vor.u32 %v2976_v47, %v2973_v9  ;;  %v3372_v42 = vsel %vm3363_vm6, %v3369_v3, %v3371_v13 }
 0x11c   : > { %v6002_v12 = vadd.f32 %v1127_v24, %v850_v33  ;;  %v4687_v36 = vpop.f32.mrf.mxu1  ;;  %4902 = vmatmul.mubr.msk.bf16.gmra.mxu1 %vm505_vm2, %v2960_v18  ;;  %v2986_v59 = vor.u32 %v2985_v45, %v2982_v62  ;;  %v2994_v18 = vrot.slane %v2992_v10, 3  ;;  %v3003_v3 = vrot.slane %v3001_v61, 3 }
 0x11d   : > { %v4721_v23 = vpop.f32.mrf.mxu0  ;;  %4936 = vmatmul.mubr.msk.bf16.vlgmr.msra.gmra.mxu0 %vm505_vm2, %v5654_v43  ;;  %v2989_v43 = vshrl.u32 %v5787_v20, 16  ;;  %v887_v16 = vadd.f32 %v4687_v36, %v5895_v54  ;;  %4905 = vmatprep.mubr.msk.bf16.mxu1 %vm505_vm2, %v2969_v46  ;;  %v2978_v9 = vsel %vm2916_vm7, %v2968_v37, %v2977_v28  ;;  %v3007_v36 = vshrl.u32 %v5819_v53, 16 }
 0x11e   : > { %v6008_v27 = vadd.f32 %v4721_v23, %v871_v26  ;;  %4939 = vmatprep.mubr.msk.bf16.mxu0 %vm505_vm2, %v3370_v31  ;;  %v878_v26 = vpop.f32.mrf.mxu1 }
 0x11f   : > { %v1140_v33 = vpop.f32.mrf.mxu0  ;;  %v879_v58 = vadd.f32 %v878_v26, %v5902_v32  ;;  %v2991_v24 = vrot.slane %v2989_v43, 2  ;;  %v2987_v32 = vsel %vm2916_vm7, %v2977_v28, %v2986_v59 }
 0x120   : > { %v6017_v5 = vadd.f32 %v1140_v33, %v863_v41  ;;  %v4688_v44 = vpop.f32.mrf.mxu1  ;;  %v3374_v41 = vsel %vm3363_vm6, %v3371_v13, %v3373_v48 }
 0x121   : > { %v4722_v50 = vpop.f32.mrf.mxu0  ;;  %v890_v0 = vadd.f32 %v4688_v44, %v5908_v11  ;;  %v3375_v11 = vrot.slane %v5761_v14, 3  ;;  %v2995_v45 = vor.u32 %v2994_v18, %v2991_v24  ;;  %v3016_v14 = vshrl.u32 %v5827_v49, 16 }
 0x122   : > { %v6023_v60 = vadd.f32 %v4722_v50, %v874_v51  ;;  %v881_v47 = vpop.f32.mrf.mxu1  ;;  %v3000_v51 = vrot.slane %v2998_v39, 2  ;;  %v3009_v44 = vrot.slane %v3007_v36, 2  ;;  %v3037_v36 = vshll.u32 %v5859_v4, 16 }
 0x123   : > { %v1143_v54 = vpop.f32.mrf.mxu0  ;;  %v882_v23 = vadd.f32 %v881_v47, %v5919_v1  ;;  %v3010_v1 = vshll.u32 %v5819_v53, 16  ;;  %v3376_v26 = vsel %vm3363_vm6, %v3373_v48, %v3375_v11  ;;  %v2996_v39 = vsel %vm2916_vm7, %v2986_v59, %v2995_v45 }
 0x124   : > { %v6028_v31 = vadd.f32 %v1143_v54, %v866_v17  ;;  %v4691_v62 = vpop.f32.mrf.mxu1  ;;  %4906 = vmatmul.mubr.msk.bf16.gmra.mxu1 %vm505_vm2, %v2978_v9  ;;  %v3377_v17 = vrot.slane %v5765_v30, 3  ;;  %v3004_v10 = vor.u32 %v3003_v3, %v3000_v51  ;;  %v3025_v51 = vshrl.u32 %v5851_v56, 16 }
 0x125   : > { %v4725_v63 = vpop.f32.mrf.mxu0  ;;  %4940 = vmatmul.mubr.msk.bf16.gmra.mxu0 %vm505_vm2, %v3372_v42  ;;  %4909 = vmatprep.mubr.msk.bf16.mxu1 %vm505_vm2, %v2987_v32  ;;  %v3012_v54 = vrot.slane %v3010_v1, 3  ;;  %v3381_v32 = vrot.slane %v5795_v8, 3  ;;  %v3028_v3 = vshll.u32 %v5851_v56, 16 }
 0x126   : > { %v6034_v46 = vadd.f32 %v4725_v63, %v887_v16  ;;  %4943 = vmatprep.mubr.msk.bf16.mxu0 %vm505_vm2, %v3374_v41  ;;  %v894_v33 = vpop.f32.mrf.mxu1  ;;  %v3019_v16 = vshll.u32 %v5827_v49, 16  ;;  %v3378_v61 = vsel %vm3363_vm6, %v3375_v11, %v3377_v17  ;;  %v3005_v18 = vsel %vm2916_vm7, %v2995_v45, %v3004_v10 }
 0x127   : > { %v1156_v37 = vpop.f32.mrf.mxu0  ;;  %v895_v9 = vadd.f32 %v894_v33, %v5781_v38  ;;  %v3013_v38 = vor.u32 %v3012_v54, %v3009_v44  ;;  %v3034_v45 = vshrl.u32 %v5859_v4, 16 }
 0x128   : > { %v6040_v13 = vadd.f32 %v1156_v37, %v879_v58  ;;  %v4692_v30 = vpop.f32.mrf.mxu1  ;;  %v903_v58 = vadd.f32 %v4691_v62, %v5772_v52  ;;  %v3021_v48 = vrot.slane %v3019_v16, 3  ;;  %v3379_v52 = vrot.slane %v5787_v20, 3 }
 0x129   : > { %v4726_v43 = vpop.f32.mrf.mxu0  ;;  %v3027_v16 = vrot.slane %v3025_v51, 2  ;;  %v3036_v44 = vrot.slane %v3034_v45, 2 }
 0x12a   : > { %v6047_v28 = vadd.f32 %v4726_v43, %v890_v0  ;;  %v897_v41 = vpop.f32.mrf.mxu1  ;;  %v3018_v0 = vrot.slane %v3016_v14, 2  ;;  %v3380_v33 = vsel %vm3363_vm6, %v3377_v17, %v3379_v52  ;;  %v3382_v14 = vsel %vm3363_vm6, %v3379_v52, %v3381_v32 }
 0x12b   : > { %v1159_v50 = vpop.f32.mrf.mxu0  ;;  %v898_v8 = vadd.f32 %v897_v41, %v5797_v25  ;;  %v3039_v17 = vrot.slane %v3037_v36, 3 }
 0x12c   : > { %v6053_v42 = vadd.f32 %v1159_v50, %v882_v23  ;;  %v4695_v59 = vpop.f32.mrf.mxu1  ;;  %4910 = vmatmul.mubr.msk.bf16.gmra.mxu1 %vm505_vm2, %v2996_v39  ;;  %v906_v23 = vadd.f32 %v4692_v30, %v5789_v7  ;;  %v3022_v20 = vor.u32 %v3021_v48, %v3018_v0  ;;  %v3014_v39 = vsel %vm2916_vm7, %v3004_v10, %v3013_v38  ;;  %v6528_v48 = vld [vmem:[#allocation2_spill] sm:$0xff] }
 0x12d   : > { %v4729_v24 = vpop.f32.mrf.mxu0  ;;  %4944 = vmatmul.mubr.msk.bf16.gmra.mxu0 %vm505_vm2, %v3376_v26  ;;  %4913 = vmatprep.mubr.msk.bf16.mxu1 %vm505_vm2, %v3005_v18  ;;  %v3030_v26 = vrot.slane %v3028_v3, 3  ;;  %v919_v30 = vadd.f32 %v4695_v59, %v5804_v34  ;;  %v3383_v34 = vrot.slane %v5819_v53, 3  ;;  %v3385_v0 = vrot.slane %v5827_v49, 3 }
 0x12e   : > { %v6058_v47 = vadd.f32 %v4729_v24, %v903_v58  ;;  %4947 = vmatprep.mubr.msk.bf16.mxu0 %vm505_vm2, %v3378_v61  ;;  %v910_v62 = vpop.f32.mrf.mxu1  ;;  %v3023_v25 = vsel %vm2916_vm7, %v3013_v38, %v3022_v20  ;;  %v3040_v53 = vor.u32 %v3039_v17, %v3036_v44  ;;  %v6533_v17 = vld [vmem:[#allocation5_spill] sm:$0xff] }
 0x12f   : > { %v1172_v63 = vpop.f32.mrf.mxu0  ;;  %v911_v54 = vadd.f32 %v910_v62, %v5813_v35  ;;  %v3031_v18 = vor.u32 %v3030_v26, %v3027_v16  ;;  %v6529_v35 = vld [vmem:[#allocation10_spill] sm:$0xff]  ;;  %v3384_v36 = vsel %vm3363_vm6, %v3381_v32, %v3383_v34 }
 0x130   : > { %v6067_v11 = vadd.f32 %v1172_v63, %v895_v9  ;;  %v4696_v43 = vpop.f32.mrf.mxu1  ;;  %v3043_v59 = vshrl.u32 %v6529_v35, 16  ;;  %v3046_v63 = vshll.u32 %v6529_v35, 16 }
 0x131   : > { %v4730_v37 = vpop.f32.mrf.mxu0  ;;  %v922_v9 = vadd.f32 %v4696_v43, %v6528_v48  ;;  %v3032_v43 = vsel %vm2916_vm7, %v3022_v20, %v3031_v18  ;;  %v3387_v20 = vrot.slane %v5851_v56, 3  ;;  %v3389_v48 = vrot.slane %v5859_v4, 3  ;;  %v6536_v4 = vld [vmem:[#allocation7_spill] sm:$0xff] }
 0x132   : > { %v6073_v1 = vadd.f32 %v4730_v37, %v906_v23  ;;  %v913_v61 = vpop.f32.mrf.mxu1  ;;  %v6530_v23 = vld [vmem:[#allocation12_spill] sm:$0xff]  ;;  %v6531_v37 = vld [vmem:[#allocation3_spill] sm:$0xff] }
 0x133   : > { %v1175_v7 = vpop.f32.mrf.mxu0  ;;  %v3052_v38 = vshrl.u32 %v6530_v23, 16  ;;  %v3055_v62 = vshll.u32 %v6530_v23, 16  ;;  %v914_v45 = vadd.f32 %v913_v61, %v6531_v37  ;;  %v3041_v61 = vsel %vm2916_vm7, %v3031_v18, %v3040_v53  ;;  %v6535_v37 = vld [vmem:[#allocation14_spill] sm:$0xff] }
 0x134   : > { %v6078_v50 = vadd.f32 %v1175_v7, %v898_v8  ;;  %v4699_v24 = vpop.f32.mrf.mxu1  ;;  %4914 = vmatmul.mubr.msk.bf16.gmra.mxu1 %vm505_vm2, %v3014_v39  ;;  %v3386_v7 = vsel %vm3363_vm6, %v3383_v34, %v3385_v0  ;;  %v3048_v39 = vrot.slane %v3046_v63, 3  ;;  %v3064_v18 = vshll.u32 %v5917_v57, 16 }
 0x135   : > { %v4733_v58 = vpop.f32.mrf.mxu0  ;;  %4948 = vmatmul.mubr.msk.bf16.gmra.mxu0 %vm505_vm2, %v3380_v33  ;;  %4917 = vmatprep.mubr.msk.bf16.mxu1 %vm505_vm2, %v3023_v25  ;;  %v3054_v44 = vrot.slane %v3052_v38, 2  ;;  %v3057_v32 = vrot.slane %v3055_v62, 3 }
 0x136   : > { %v6084_v41 = vadd.f32 %v4733_v58, %v919_v30  ;;  %4951 = vmatprep.mubr.msk.bf16.mxu0 %vm505_vm2, %v3382_v14  ;;  %v926_v51 = vpop.f32.mrf.mxu1  ;;  %v6532_v14 = vld [vmem:[#allocation4_spill] sm:$0xff]  ;;  %v3045_v30 = vrot.slane %v3043_v59, 2  ;;  %v6534_v59 = vld [vmem:[#allocation6_spill] sm:$0xff] }
 0x137   : > { %v1188_v10 = vpop.f32.mrf.mxu0  ;;  %v935_v16 = vadd.f32 %v4699_v24, %v6532_v14  ;;  %v3058_v62 = vor.u32 %v3057_v32, %v3054_v44 }
 0x138   : > { %v6091_v52 = vadd.f32 %v1188_v10, %v911_v54  ;;  %v4700_v8 = vpop.f32.mrf.mxu1  ;;  %v927_v54 = vadd.f32 %v926_v51, %v6533_v17  ;;  %v3049_v51 = vor.u32 %v3048_v39, %v3045_v30  ;;  %v6130_v30 = vld [vmem:[%s5153_s25 + $0xa0] ss:$0 sps:$4 sm:$0x77]   ;;  %v6537_v39 = vld [vmem:[#allocation8_spill] sm:$0xff] }
 0x139   : > { %v4734_v3 = vpop.f32.mrf.mxu0  ;;  %v938_v63 = vadd.f32 %v4700_v8, %v6534_v59 }
 0x13a   : > { %v6099_v49 = vadd.f32 %v4734_v3, %v922_v9  ;;  %v929_v58 = vpop.f32.mrf.mxu1  ;;  %v3061_v9 = vshrl.u32 %v5917_v57, 16  ;;  %v3050_v17 = vsel %vm2916_vm7, %v3040_v53, %v3049_v51 }
 0x13b   : > { %v1191_v33 = vpop.f32.mrf.mxu0 }
 0x13c   : > { %v6105_v26 = vadd.f32 %v1191_v33, %v914_v45  ;;  %v4703_v34 = vpop.f32.mrf.mxu1  ;;  %4918 = vmatmul.mubr.msk.bf16.gmra.mxu1 %vm505_vm2, %v3032_v43  ;;  %v3070_v45 = vshrl.u32 %v6535_v37, 16  ;;  %v930_v33 = vadd.f32 %v929_v58, %v6536_v4  ;;  %v3393_v4 = vrot.slane %v6530_v23, 3 }
 0x13d   : > { %v4737_v25 = vpop.f32.mrf.mxu0  ;;  %4952 = vmatmul.mubr.msk.bf16.gmra.mxu0 %vm505_vm2, %v3384_v36  ;;  %4921 = vmatprep.mubr.msk.bf16.mxu1 %vm505_vm2, %v3041_v61  ;;  %v3073_v36 = vshll.u32 %v6535_v37, 16  ;;  %v3066_v61 = vrot.slane %v3064_v18, 3  ;;  %v951_v44 = vadd.f32 %v4703_v34, %v6537_v39  ;;  %v3391_v34 = vrot.slane %v6529_v35, 3 }
 0x13e   : > { %v6110_v10 = vadd.f32 %v4737_v25, %v935_v16  ;;  %4955 = vmatprep.mubr.msk.bf16.mxu0 %vm505_vm2, %v3386_v7  ;;  %v942_v38 = vpop.f32.mrf.mxu1  ;;  %v3388_v7 = vsel %vm3363_vm6, %v3385_v0, %v3387_v20  ;;  %v3390_v16 = vsel %vm3363_vm6, %v3387_v20, %v3389_v48  ;;  %v3063_v25 = vrot.slane %v3061_v9, 2 }
 0x13f   : > { %v1204_v24 = vpop.f32.mrf.mxu0  ;;  %v3059_v0 = vsel %vm2916_vm7, %v3049_v51, %v3058_v62  ;;  %v3075_v59 = vrot.slane %v3073_v36, 3  ;;  %v6539_v51 = vld [vmem:[#allocation11_spill] sm:$0xff] }
 0x140   : > { %v6119_v3 = vadd.f32 %v1204_v24, %v927_v54  ;;  %v4704_v8 = vpop.f32.mrf.mxu1  ;;  %v3072_v24 = vrot.slane %v3070_v45, 2  ;;  %v6540_v36 = vld [vmem:[#allocation15_spill] sm:$0xff] }
 0x141   : > { %v4738_v56 = vpop.f32.mrf.mxu0  ;;  %v954_v45 = vadd.f32 %v4704_v8, %v6539_v51 }
 0x142   : > { %v6125_v43 = vadd.f32 %v4738_v56, %v938_v63  ;;  %v945_v54 = vpop.f32.mrf.mxu1  ;;  %v6538_v63 = vld [vmem:[#allocation9_spill] sm:$0xff]  ;;  %v3067_v56 = vor.u32 %v3066_v61, %v3063_v25  ;;  %v3076_v39 = vor.u32 %v3075_v59, %v3072_v24  ;;  %v6542_v25 = vld [vmem:[#allocation16_spill] sm:$0xff] }
 0x143   : > { %v1207_v14 = vpop.f32.mrf.mxu0  ;;  %v943_v20 = vadd.f32 %v942_v38, %v6538_v63 }
 0x144   : > { %v6133_v32 = vadd.f32 %v1207_v14, %v930_v33  ;;  %v4747_v18 = vpop.f32.mrf.mxu1  ;;  %4922 = vmatmul.mubr.msk.bf16.gmra.mxu1 %vm505_vm2, %v3050_v17  ;;  %v3079_v33 = vshrl.u32 %v6130_v30, 16  ;;  %v3082_v14 = vshll.u32 %v6130_v30, 16 }
 0x145   : > { %v4741_v58 = vpop.f32.mrf.mxu0  ;;  %4956 = vmatmul.mubr.msk.bf16.gmra.mxu0 %vm505_vm2, %v3388_v7  ;;  %v1676_v7 = vadd.f32 %v4747_v18, %v6540_v36  ;;  %4925 = vmatprep.mubr.msk.bf16.mxu1 %vm505_vm2, %v3059_v0  ;;  %v3394_v18 = vsel %vm3363_vm6, %v3391_v34, %v3393_v4 }
 0x146   : > { %v6139_v9 = vadd.f32 %v4741_v58, %v951_v44  ;;  %4959 = vmatprep.mubr.msk.bf16.mxu0 %vm505_vm2, %v3390_v16  ;;  %v1531_v35 = vpop.f32.mrf.mxu1  ;;  %v6541_v44 = vld [vmem:[#allocation13_spill] sm:$0xff]  ;;  %v3392_v58 = vsel %vm3363_vm6, %v3389_v48, %v3391_v34  ;;  %v3081_v51 = vrot.slane %v3079_v33, 2  ;;  %v3084_v24 = vrot.slane %v3082_v14, 3 }
 0x147   : > { %v1220_v53 = vpop.f32.mrf.mxu0  ;;  %v946_v17 = vadd.f32 %v945_v54, %v6541_v44  ;;  %v1674_v61 = vadd.f32 %v1531_v35, %v6542_v25  ;;  %v3397_v33 = vrot.slane %v6535_v37, 3 }
 0x148   : > { %v6148_v38 = vadd.f32 %v1220_v53, %v943_v20  ;;  %v4748_v8 = vpop.f32.mrf.mxu1  ;;  %v3068_v20 = vsel %vm2916_vm7, %v3058_v62, %v3067_v56  ;;  %v3395_v62 = vrot.slane %v5917_v57, 3 }
 0x149   : > { %v4742_v16 = vpop.f32.mrf.mxu0  ;;  %v1677_v0 = vadd.f32 %v4748_v8, %v5945_v19 }
 0x14a   : > { %v6154_v23 = vadd.f32 %v4742_v16, %v954_v45  ;;  %v1534_v59 = vpop.f32.mrf.mxu1  ;;  %v3077_v45 = vsel %vm2916_vm7, %v3067_v56, %v3076_v39  ;;  %v3085_v56 = vor.u32 %v3084_v24, %v3081_v51  ;;  %v3396_v57 = vsel %vm3363_vm6, %v3393_v4, %v3395_v62 }
 0x14b   : > { %v1223_v63 = vpop.f32.mrf.mxu0  ;;  %v1675_v48 = vadd.f32 %v1534_v59, %v5951_v21  ;;  %v3399_v4 = vrot.slane %v6130_v30, 3 }
 0x14c   : > { %v6160_v53 = vadd.f32 %v1223_v63, %v946_v17  ;;  %v4751_v34 = vpop.f32.mrf.mxu1  ;;  %4926 = vmatmul.mubr.msk.bf16.gmra.mxu1 %vm505_vm2, %v3068_v20 }
 0x14d   : > { %v4785_v54 = vpop.f32.mrf.mxu0  ;;  %4960 = vmatmul.mubr.msk.bf16.gmra.mxu0 %vm505_vm2, %v3392_v58  ;;  %v1680_v14 = vadd.f32 %v4751_v34, %v5956_v15  ;;  %4929 = vmatprep.mubr.msk.bf16.mxu1 %vm505_vm2, %v3077_v45  ;;  %v3398_v58 = vsel %vm3363_vm6, %v3395_v62, %v3397_v33 }
 0x14e   : > { %v6165_v36 = vadd.f32 %v4785_v54, %v1676_v7  ;;  %4963 = vmatprep.mubr.msk.bf16.mxu0 %vm505_vm2, %v3394_v18  ;;  %v1547_v21 = vpop.f32.mrf.mxu1 }
 0x14f   : > { %v1978_v19 = vpop.f32.mrf.mxu0  ;;  %v1678_v16 = vadd.f32 %v1547_v21, %v5964_v6 }
 0x150   : > { %v6172_v35 = vadd.f32 %v1978_v19, %v1674_v61  ;;  %v4752_v17 = vpop.f32.mrf.mxu1  ;;  %v3086_v61 = vsel %vm2916_vm7, %v3076_v39, %v3085_v56 }
 0x151   : > { %v4786_v7 = vpop.f32.mrf.mxu0  ;;  %v1681_v37 = vadd.f32 %v4752_v17, %v5970_v22 }
 0x152   : > { %v6176_v44 = vadd.f32 %v4786_v7, %v1677_v0  ;;  %v1550_v8 = vpop.f32.mrf.mxu1 }
 0x153   : > { %v1981_v25 = vpop.f32.mrf.mxu0  ;;  %v1679_v6 = vadd.f32 %v1550_v8, %v5974_v55  ;;  %v3400_v55 = vsel %vm3363_vm6, %v3397_v33, %v3399_v4 }
 0x154   : > { %v6181_v15 = vadd.f32 %v1981_v25, %v1675_v48  ;;  %v4755_v18 = vpop.f32.mrf.mxu1  ;;  %4930 = vmatmul.mubr.msk.bf16.gmra.mxu1 %vm505_vm2, %v3086_v61 }
 0x155   : > { %v4789_v63 = vpop.f32.mrf.mxu0  ;;  %4964 = vmatmul.mubr.msk.bf16.gmra.mxu0 %vm505_vm2, %v3396_v57  ;;  %v1684_v0 = vadd.f32 %v4755_v18, %v5980_v40 }
 0x156   : > { %v6186_v20 = vadd.f32 %v4789_v63, %v1680_v14  ;;  %4967 = vmatprep.mubr.msk.bf16.mxu0 %vm505_vm2, %v3398_v58  ;;  %v1563_v39 = vpop.f32.mrf.mxu1 }
 0x157   : > { %v1994_v22 = vpop.f32.mrf.mxu0  ;;  %v1682_v59 = vadd.f32 %v1563_v39, %v5987_v29 }
 0x158   : > { %v6192_v51 = vadd.f32 %v1994_v22, %v1678_v16  ;;  %v4756_v45 = vpop.f32.mrf.mxu1 }
 0x159   : > { %v4790_v24 = vpop.f32.mrf.mxu0  ;;  %v1685_v30 = vadd.f32 %v4756_v45, %v5995_v2 }
 0x15a   : > { %v6195_v54 = vadd.f32 %v4790_v24, %v1681_v37  ;;  %v1566_v34 = vpop.f32.mrf.mxu1 }
 0x15b   : > { %v1997_v48 = vpop.f32.mrf.mxu0  ;;  %v1683_v40 = vadd.f32 %v1566_v34, %v6002_v12 }
 0x15c   : > { %v6199_v62 = vadd.f32 %v1997_v48, %v1679_v6  ;;  %v4759_v56 = vpop.f32.mrf.mxu1 }
 0x15d   : > { %v4793_v19 = vpop.f32.mrf.mxu0  ;;  %4968 = vmatmul.mubr.msk.bf16.gmra.mxu0 %vm505_vm2, %v3400_v55  ;;  %v1688_v21 = vadd.f32 %v4759_v56, %v6008_v27 }
 0x15e   : > { %v6203_v14 = vadd.f32 %v4793_v19, %v1684_v0  ;;  %v1579_v33 = vpop.f32.mrf.mxu1 }
 0x15f   : > { %v2010_v29 = vpop.f32.mrf.mxu0  ;;  %v1686_v2 = vadd.f32 %v1579_v33, %v6017_v5 }
 0x160   : > { %v6206_v7 = vadd.f32 %v2010_v29, %v1682_v59  ;;  %v4760_v17 = vpop.f32.mrf.mxu1 }
 0x161   : > { %v4794_v16 = vpop.f32.mrf.mxu0  ;;  %v1689_v58 = vadd.f32 %v4760_v17, %v6023_v60 }
 0x162   : > { %v6209_v57 = vadd.f32 %v4794_v16, %v1685_v30  ;;  %v1582_v12 = vpop.f32.mrf.mxu1 }
 0x163   : > { %v2013_v25 = vpop.f32.mrf.mxu0  ;;  %v1687_v8 = vadd.f32 %v1582_v12, %v6028_v31 }
 0x164   : > { %v6212_v37 = vadd.f32 %v2013_v25, %v1683_v40  ;;  %v4763_v27 = vpop.f32.mrf.mxu1 }
 0x165   : > { %v4797_v61 = vpop.f32.mrf.mxu0  ;;  %v1692_v4 = vadd.f32 %v4763_v27, %v6034_v46 }
 0x166   : > { %v6215_v63 = vadd.f32 %v4797_v61, %v1688_v21  ;;  %v1595_v5 = vpop.f32.mrf.mxu1 }
 0x167   : > { %v2026_v6 = vpop.f32.mrf.mxu0  ;;  %v1690_v0 = vadd.f32 %v1595_v5, %v6040_v13 }
 0x168   : > { %v6218_v18 = vadd.f32 %v2026_v6, %v1686_v2  ;;  %v4764_v60 = vpop.f32.mrf.mxu1 }
 0x169   : > { %v4798_v22 = vpop.f32.mrf.mxu0  ;;  %v1693_v59 = vadd.f32 %v4764_v60, %v6047_v28 }
 0x16a   : > { %v6221_v39 = vadd.f32 %v4798_v22, %v1689_v58  ;;  %v1598_v31 = vpop.f32.mrf.mxu1 }
 0x16b   : > { %v2029_v24 = vpop.f32.mrf.mxu0  ;;  %v1691_v48 = vadd.f32 %v1598_v31, %v6053_v42 }
 0x16c   : > { %v6224_v55 = vadd.f32 %v2029_v24, %v1687_v8  ;;  %v4767_v46 = vpop.f32.mrf.mxu1 }
 0x16d   : > { %v4801_v45 = vpop.f32.mrf.mxu0  ;;  %v1696_v19 = vadd.f32 %v4767_v46, %v6058_v47 }
 0x16e   : > { %v6227_v30 = vadd.f32 %v4801_v45, %v1692_v4  ;;  %v1611_v13 = vpop.f32.mrf.mxu1 }
 0x16f   : > { %v2042_v34 = vpop.f32.mrf.mxu0  ;;  %v1694_v29 = vadd.f32 %v1611_v13, %v6067_v11 }
 0x170   : > { %v6230_v40 = vadd.f32 %v2042_v34, %v1690_v0  ;;  %v4768_v28 = vpop.f32.mrf.mxu1 }
 0x171   : > { %v4802_v56 = vpop.f32.mrf.mxu0  ;;  %v1697_v16 = vadd.f32 %v4768_v28, %v6073_v1 }
 0x172   : > { %v6233_v21 = vadd.f32 %v4802_v56, %v1693_v59  ;;  %v1614_v42 = vpop.f32.mrf.mxu1 }
 0x173   : > { %v2045_v33 = vpop.f32.mrf.mxu0  ;;  %v1695_v25 = vadd.f32 %v1614_v42, %v6078_v50 }
 0x174   : > { %v6236_v2 = vadd.f32 %v2045_v33, %v1691_v48  ;;  %v4771_v47 = vpop.f32.mrf.mxu1 }
 0x175   : > { %v4805_v17 = vpop.f32.mrf.mxu0  ;;  %v1700_v61 = vadd.f32 %v4771_v47, %v6084_v41 }
 0x176   : > { %v6239_v58 = vadd.f32 %v4805_v17, %v1696_v19  ;;  %v1627_v11 = vpop.f32.mrf.mxu1 }
 0x177   : > { %v2058_v12 = vpop.f32.mrf.mxu0  ;;  %v1698_v6 = vadd.f32 %v1627_v11, %v6091_v52 }
 0x178   : > { %v6242_v8 = vadd.f32 %v2058_v12, %v1694_v29  ;;  %v4772_v1 = vpop.f32.mrf.mxu1 }
 0x179   : > { %v4806_v27 = vpop.f32.mrf.mxu0  ;;  %v1701_v22 = vadd.f32 %v4772_v1, %v6099_v49 }
 0x17a   : > { %v6245_v4 = vadd.f32 %v4806_v27, %v1697_v16  ;;  %v1630_v50 = vpop.f32.mrf.mxu1 }
 0x17b   : > { %v2061_v5 = vpop.f32.mrf.mxu0  ;;  %v1699_v24 = vadd.f32 %v1630_v50, %v6105_v26 }
 0x17c   : > { %v6248_v0 = vadd.f32 %v2061_v5, %v1695_v25  ;;  %v4775_v41 = vpop.f32.mrf.mxu1 }
 0x17d   : > { %v4809_v60 = vpop.f32.mrf.mxu0  ;;  %v1704_v45 = vadd.f32 %v4775_v41, %v6110_v10 }
 0x17e   : > { %v6251_v59 = vadd.f32 %v4809_v60, %v1700_v61  ;;  %v1643_v52 = vpop.f32.mrf.mxu1 }
 0x17f   : > { %v2074_v31 = vpop.f32.mrf.mxu0  ;;  %v1702_v34 = vadd.f32 %v1643_v52, %v6119_v3 }
 0x180   : > { %v6254_v48 = vadd.f32 %v2074_v31, %v1698_v6  ;;  %v4776_v49 = vpop.f32.mrf.mxu1 }
 0x181   : > { %v4810_v46 = vpop.f32.mrf.mxu0  ;;  %v1705_v56 = vadd.f32 %v4776_v49, %v6125_v43 }
 0x182   : > { %v6257_v19 = vadd.f32 %v4810_v46, %v1701_v22  ;;  %v1646_v26 = vpop.f32.mrf.mxu1 }
 0x183   : > { %v2077_v13 = vpop.f32.mrf.mxu0  ;;  %v1703_v33 = vadd.f32 %v1646_v26, %v6133_v32 }
 0x184   : > { %v6260_v29 = vadd.f32 %v2077_v13, %v1699_v24  ;;  %v4779_v10 = vpop.f32.mrf.mxu1 }
 0x185   : > { %v4813_v28 = vpop.f32.mrf.mxu0  ;;  %v1708_v17 = vadd.f32 %v4779_v10, %v6139_v9 }
 0x186   : > { %v6263_v16 = vadd.f32 %v4813_v28, %v1704_v45  ;;  %v1659_v3 = vpop.f32.mrf.mxu1 }
 0x187   : > { %v2090_v42 = vpop.f32.mrf.mxu0  ;;  %v1706_v12 = vadd.f32 %v1659_v3, %v6148_v38 }
 0x188   : > { %v6266_v25 = vadd.f32 %v2090_v42, %v1702_v34  ;;  %v4780_v43 = vpop.f32.mrf.mxu1 }
 0x189   : > { %v4814_v47 = vpop.f32.mrf.mxu0  ;;  %v1709_v27 = vadd.f32 %v4780_v43, %v6154_v23 }
 0x18a   : > { %v6269_v61 = vadd.f32 %v4814_v47, %v1705_v56  ;;  %v1662_v32 = vpop.f32.mrf.mxu1 }
 0x18b   : > { %v2093_v11 = vpop.f32.mrf.mxu0  ;;  %v1707_v5 = vadd.f32 %v1662_v32, %v6160_v53 }
 0x18c   : > { %v6272_v6 = vadd.f32 %v2093_v11, %v1703_v33  ;;  %v4823_v9 = vpop.f32.mrf.mxu1 }
 0x18d   : > { %v4817_v1 = vpop.f32.mrf.mxu0  ;;  %v2437_v60 = vadd.f32 %v4823_v9, %v6165_v36 }
 0x18e   : > { %v6275_v22 = vadd.f32 %v4817_v1, %v1708_v17  ;;  %v2292_v38 = vpop.f32.mrf.mxu1 }
 0x18f   : > { %v2106_v50 = vpop.f32.mrf.mxu0  ;;  %v2435_v31 = vadd.f32 %v2292_v38, %v6172_v35 }
 0x190   : > { %v6278_v24 = vadd.f32 %v2106_v50, %v1706_v12  ;;  %v4824_v23 = vpop.f32.mrf.mxu1 }
 0x191   : > { %v4818_v41 = vpop.f32.mrf.mxu0  ;;  %v2438_v46 = vadd.f32 %v4824_v23, %v6176_v44 }
 0x192   : > { %v6281_v45 = vadd.f32 %v4818_v41, %v1709_v27  ;;  %v2295_v53 = vpop.f32.mrf.mxu1 }
 0x193   : > { %v2109_v52 = vpop.f32.mrf.mxu0  ;;  %v2436_v13 = vadd.f32 %v2295_v53, %v6181_v15 }
 0x194   : > { %v6284_v34 = vadd.f32 %v2109_v52, %v1707_v5  ;;  %v4827_v36 = vpop.f32.mrf.mxu1 }
 0x195   : > { %v4861_v49 = vpop.f32.mrf.mxu0  ;;  %v2441_v28 = vadd.f32 %v4827_v36, %v6186_v20 }
 0x196   : > { %v6287_v56 = vadd.f32 %v4861_v49, %v2437_v60  ;;  %v2308_v35 = vpop.f32.mrf.mxu1 }
 0x197   : > { %v2731_v26 = vpop.f32.mrf.mxu0  ;;  %v2439_v42 = vadd.f32 %v2308_v35, %v6192_v51 }
 0x198   : > { %v6290_v33 = vadd.f32 %v2731_v26, %v2435_v31  ;;  %v4828_v44 = vpop.f32.mrf.mxu1 }
 0x199   : > { %v4862_v10 = vpop.f32.mrf.mxu0  ;;  %v2442_v47 = vadd.f32 %v4828_v44, %v6195_v54 }
 0x19a   : > { %v6293_v17 = vadd.f32 %v4862_v10, %v2438_v46  ;;  %v2311_v15 = vpop.f32.mrf.mxu1 }
 0x19b   : > { %v2734_v3 = vpop.f32.mrf.mxu0  ;;  %v2440_v11 = vadd.f32 %v2311_v15, %v6199_v62 }
 0x19c   : > { %v6296_v12 = vadd.f32 %v2734_v3, %v2436_v13  ;;  %v4831_v20 = vpop.f32.mrf.mxu1 }
 0x19d   : > { %v4865_v43 = vpop.f32.mrf.mxu0  ;;  %v2445_v1 = vadd.f32 %v4831_v20, %v6203_v14 }
 0x19e   : > { %v6299_v27 = vadd.f32 %v4865_v43, %v2441_v28  ;;  %v2324_v51 = vpop.f32.mrf.mxu1 }
 0x19f   : > { %v2747_v32 = vpop.f32.mrf.mxu0  ;;  %v2443_v50 = vadd.f32 %v2324_v51, %v6206_v7 }
 0x1a0   : > { %v6302_v5 = vadd.f32 %v2747_v32, %v2439_v42  ;;  %v4832_v54 = vpop.f32.mrf.mxu1 }
 0x1a1   : > { %v4866_v9 = vpop.f32.mrf.mxu0  ;;  %v2446_v41 = vadd.f32 %v4832_v54, %v6209_v57 }
 0x1a2   : > { %v6305_v60 = vadd.f32 %v4866_v9, %v2442_v47  ;;  %v2327_v62 = vpop.f32.mrf.mxu1 }
 0x1a3   : > { %v2750_v38 = vpop.f32.mrf.mxu0  ;;  %v2444_v52 = vadd.f32 %v2327_v62, %v6212_v37 }
 0x1a4   : > { %v6308_v31 = vadd.f32 %v2750_v38, %v2440_v11  ;;  %v4835_v14 = vpop.f32.mrf.mxu1 }
 0x1a5   : > { %v4869_v23 = vpop.f32.mrf.mxu0  ;;  %v2449_v49 = vadd.f32 %v4835_v14, %v6215_v63 }
 0x1a6   : > { %v6311_v46 = vadd.f32 %v4869_v23, %v2445_v1  ;;  %v2340_v7 = vpop.f32.mrf.mxu1 }
 0x1a7   : > { %v2763_v53 = vpop.f32.mrf.mxu0  ;;  %v2447_v26 = vadd.f32 %v2340_v7, %v6218_v18 }
 0x1a8   : > { %v6314_v13 = vadd.f32 %v2763_v53, %v2443_v50  ;;  %v4836_v57 = vpop.f32.mrf.mxu1 }
 0x1a9   : > { %v4870_v36 = vpop.f32.mrf.mxu0  ;;  %v2450_v10 = vadd.f32 %v4836_v57, %v6221_v39 }
 0x1aa   : > { %v6317_v28 = vadd.f32 %v4870_v36, %v2446_v41  ;;  %v2343_v37 = vpop.f32.mrf.mxu1 }
 0x1ab   : > { %v2766_v35 = vpop.f32.mrf.mxu0  ;;  %v2448_v3 = vadd.f32 %v2343_v37, %v6224_v55 }
 0x1ac   : > { %v6320_v42 = vadd.f32 %v2766_v35, %v2444_v52  ;;  %v4839_v63 = vpop.f32.mrf.mxu1 }
 0x1ad   : > { %v4873_v44 = vpop.f32.mrf.mxu0  ;;  %v2453_v43 = vadd.f32 %v4839_v63, %v6227_v30 }
 0x1ae   : > { %v6323_v47 = vadd.f32 %v4873_v44, %v2449_v49  ;;  %v2356_v18 = vpop.f32.mrf.mxu1 }
 0x1af   : > { %v2779_v15 = vpop.f32.mrf.mxu0  ;;  %v2451_v32 = vadd.f32 %v2356_v18, %v6230_v40 }
 0x1b0   : > { %v6326_v11 = vadd.f32 %v2779_v15, %v2447_v26  ;;  %v4840_v39 = vpop.f32.mrf.mxu1 }
 0x1b1   : > { %v4874_v20 = vpop.f32.mrf.mxu0  ;;  %v2454_v9 = vadd.f32 %v4840_v39, %v6233_v21 }
 0x1b2   : > { %v6329_v1 = vadd.f32 %v4874_v20, %v2450_v10  ;;  %v2359_v55 = vpop.f32.mrf.mxu1 }
 0x1b3   : > { %v2782_v51 = vpop.f32.mrf.mxu0  ;;  %v2452_v38 = vadd.f32 %v2359_v55, %v6236_v2 }
 0x1b4   : > { %v6332_v50 = vadd.f32 %v2782_v51, %v2448_v3  ;;  %v4843_v30 = vpop.f32.mrf.mxu1 }
 0x1b5   : > { %v4877_v54 = vpop.f32.mrf.mxu0  ;;  %v2457_v23 = vadd.f32 %v4843_v30, %v6239_v58 }
 0x1b6   : > { %v6335_v41 = vadd.f32 %v4877_v54, %v2453_v43  ;;  %v2372_v40 = vpop.f32.mrf.mxu1 }
 0x1b7   : > { %v2795_v62 = vpop.f32.mrf.mxu0  ;;  %v2455_v53 = vadd.f32 %v2372_v40, %v6242_v8 }
 0x1b8   : > { %v6338_v52 = vadd.f32 %v2795_v62, %v2451_v32  ;;  %v4844_v21 = vpop.f32.mrf.mxu1 }
 0x1b9   : > { %v4878_v14 = vpop.f32.mrf.mxu0  ;;  %v2458_v36 = vadd.f32 %v4844_v21, %v6245_v4 }
 0x1ba   : > { %v6341_v49 = vadd.f32 %v4878_v14, %v2454_v9  ;;  %v2375_v2 = vpop.f32.mrf.mxu1 }
 0x1bb   : > { %v2798_v7 = vpop.f32.mrf.mxu0  ;;  %v2456_v35 = vadd.f32 %v2375_v2, %v6248_v0 }
 0x1bc   : > { %v6344_v26 = vadd.f32 %v2798_v7, %v2452_v38  ;;  %v4847_v58 = vpop.f32.mrf.mxu1 }
 0x1bd   : > { %v4881_v57 = vpop.f32.mrf.mxu0  ;;  %v2461_v44 = vadd.f32 %v4847_v58, %v6251_v59 }
 0x1be   : > { %v6347_v10 = vadd.f32 %v4881_v57, %v2457_v23  ;;  %v2388_v8 = vpop.f32.mrf.mxu1 }
 0x1bf   : > { %v2811_v37 = vpop.f32.mrf.mxu0  ;;  %v2459_v15 = vadd.f32 %v2388_v8, %v6254_v48 }
 0x1c0   : > { %v6350_v3 = vadd.f32 %v2811_v37, %v2455_v53  ;;  %v4848_v4 = vpop.f32.mrf.mxu1 }
 0x1c1   : > { %v4882_v63 = vpop.f32.mrf.mxu0  ;;  %v2462_v20 = vadd.f32 %v4848_v4, %v6257_v19 }
 0x1c2   : > { %v6353_v43 = vadd.f32 %v4882_v63, %v2458_v36  ;;  %v2391_v0 = vpop.f32.mrf.mxu1 }
 0x1c3   : > { %v2814_v18 = vpop.f32.mrf.mxu0  ;;  %v2460_v51 = vadd.f32 %v2391_v0, %v6260_v29 }
 0x1c4   : > { %v6356_v32 = vadd.f32 %v2814_v18, %v2456_v35  ;;  %v4851_v59 = vpop.f32.mrf.mxu1 }
 0x1c5   : > { %v4885_v39 = vpop.f32.mrf.mxu0  ;;  %v2465_v54 = vadd.f32 %v4851_v59, %v6263_v16 }
 0x1c6   : > { %v6359_v9 = vadd.f32 %v4885_v39, %v2461_v44  ;;  %v2404_v48 = vpop.f32.mrf.mxu1 }
 0x1c7   : > { %v2827_v55 = vpop.f32.mrf.mxu0  ;;  %v2463_v62 = vadd.f32 %v2404_v48, %v6266_v25 }
 0x1c8   : > { %v6362_v38 = vadd.f32 %v2827_v55, %v2459_v15  ;;  %v4852_v19 = vpop.f32.mrf.mxu1 }
 0x1c9   : > { %v4886_v30 = vpop.f32.mrf.mxu0  ;;  %v2466_v14 = vadd.f32 %v4852_v19, %v6269_v61 }
 0x1ca   : > { %v6365_v23 = vadd.f32 %v4886_v30, %v2462_v20  ;;  %v2407_v29 = vpop.f32.mrf.mxu1 }
 0x1cb   : > { %v2830_v40 = vpop.f32.mrf.mxu0  ;;  %v2464_v7 = vadd.f32 %v2407_v29, %v6272_v6 }
 0x1cc   : > { %v6368_v53 = vadd.f32 %v2830_v40, %v2460_v51  ;;  %v4855_v16 = vpop.f32.mrf.mxu1 }
 0x1cd   : > { %v4889_v21 = vpop.f32.mrf.mxu0  ;;  %v2469_v57 = vadd.f32 %v4855_v16, %v6275_v22 }
 0x1ce   : > { %v6371_v36 = vadd.f32 %v4889_v21, %v2465_v54  ;;  %v2420_v25 = vpop.f32.mrf.mxu1 }
 0x1cf   : > { %v2843_v2 = vpop.f32.mrf.mxu0  ;;  %v2467_v37 = vadd.f32 %v2420_v25, %v6278_v24 }
 0x1d0   : > { %v6374_v35 = vadd.f32 %v2843_v2, %v2463_v62  ;;  %v4856_v61 = vpop.f32.mrf.mxu1 }
 0x1d1   : > { %v4890_v58 = vpop.f32.mrf.mxu0  ;;  %v2470_v63 = vadd.f32 %v4856_v61, %v6281_v45 }
 0x1d2   : > { %v6377_v44 = vadd.f32 %v4890_v58, %v2466_v14  ;;  %v2423_v6 = vpop.f32.mrf.mxu1  ;;  %v6396_v14 = vld [vmem:[%s6503_s2] ss:$0 sm:$0xff] }
 0x1d3   : > { %v2846_v8 = vpop.f32.mrf.mxu0  ;;  %v2468_v18 = vadd.f32 %v2423_v6, %v6284_v34 }
 0x1d4   : > { %v6380_v15 = vadd.f32 %v2846_v8, %v2464_v7  ;;  %v4899_v22 = vpop.f32.mrf.mxu1 }
 0x1d5   : > { %v4893_v4 = vpop.f32.mrf.mxu0  ;;  %v3323_v45 = vadd.f32 %v4899_v22, %v6287_v56 }
 0x1d6   : > { %v6383_v20 = vadd.f32 %v4893_v4, %v2469_v57  ;;  %v3178_v51 = vpop.f32.mrf.mxu1 }
 0x1d7   : > { %v2859_v0 = vpop.f32.mrf.mxu0  ;;  %v3321_v34 = vadd.f32 %v3178_v51, %v6290_v33 }
 0x1d8   : > { %v6385_v39 = vadd.f32 %v2859_v0, %v2467_v37  ;;  %v4900_v55 = vpop.f32.mrf.mxu1 }
 0x1d9   : > { %v4894_v24 = vpop.f32.mrf.mxu0  ;;  %v3324_v21 = vadd.f32 %v4900_v55, %v6293_v17 }
 0x1da   : > { %v6387_v59 = vadd.f32 %v4894_v24, %v2470_v63  ;;  %v3181_v30 = vpop.f32.mrf.mxu1 }
 0x1db   : > { %v2862_v54 = vpop.f32.mrf.mxu0  ;;  %v3322_v2 = vadd.f32 %v3181_v30, %v6296_v12 }
 0x1dc   : > { %v6390_v48 = vadd.f32 %v2862_v54, %v2468_v18  ;;  %v4903_v40 = vpop.f32.mrf.mxu1 }
 0x1dd   : > { %v4937_v62 = vpop.f32.mrf.mxu0  ;;  %v3327_v37 = vadd.f32 %v4903_v40, %v6299_v27 }
 0x1de   : > { %v3637_v19 = vadd.f32 %v4937_v62, %v3323_v45  ;;  %v3194_v16 = vpop.f32.mrf.mxu1 }
 0x1df   : > { %v3492_v29 = vpop.f32.mrf.mxu0  ;;  %v3325_v0 = vadd.f32 %v3194_v16, %v6302_v5 }
 0x1e0   : > { %v3635_v7 = vadd.f32 %v3492_v29, %v3321_v34  ;;  %v3680_v57 = vadd.f32 %v6396_v14, %v3637_v19  ;;  %v4904_v58 = vpop.f32.mrf.mxu1 }
 0x1e1   : > { %v4938_v56 = vpop.f32.mrf.mxu0  ;;  %v3328_v55 = vadd.f32 %v4904_v58, %v6305_v60 }
 0x1e2   : > { %v3638_v25 = vadd.f32 %v4938_v56, %v3324_v21  ;;  %v3678_v61 = vadd.f32 %v6396_v14, %v3635_v7  ;;  %v3197_v6 = vpop.f32.mrf.mxu1  ;;  %v3716_v4 = vmax.f32 %v3680_v57, 0.0 }
 0x1e3   : > { %v3495_v33 = vpop.f32.mrf.mxu0  ;;  %v3326_v5 = vadd.f32 %v3197_v6, %v6308_v31 }
 0x1e4   : > { %v3681_v8 = vadd.f32 %v6396_v14, %v3638_v25  ;;  %v3636_v63 = vadd.f32 %v3495_v33, %v3322_v2  ;;  %v4907_v27 = vpop.f32.mrf.mxu1  ;;  %v3714_v24 = vmax.f32 %v3678_v61, 0.0 }
 0x1e5   : > { %v4941_v17 = vpop.f32.mrf.mxu0  ;;  %v3331_v16 = vadd.f32 %v4907_v27, %v6311_v46 }
 0x1e6   : > { %v3717_v18 = vmax.f32 %v3681_v8, 0.0  ;;  %v3679_v22 = vadd.f32 %v6396_v14, %v3636_v63  ;;  %v3641_v12 = vadd.f32 %v4941_v17, %v3327_v37  ;;  %v3210_v30 = vpop.f32.mrf.mxu1 }
 0x1e7   : > { %v3508_v51 = vpop.f32.mrf.mxu0  ;;  %v3329_v61 = vadd.f32 %v3210_v30, %v6314_v13 }
 0x1e8   : > { %v4359_v54 = vpack.c.bf16 %v3717_v18, %v3716_v4  ;;  %v3715_v45 = vmax.f32 %v3679_v22, 0.0  ;;  %v3639_v62 = vadd.f32 %v3508_v51, %v3325_v0  ;;  %v3684_v40 = vadd.f32 %v6396_v14, %v3641_v12  ;;  %v4908_v21 = vpop.f32.mrf.mxu1 }
 0x1e9   : > { %v4942_v34 = vpop.f32.mrf.mxu0  ;;  %v3332_v46 = vadd.f32 %v4908_v21, %v6317_v28 }
 0x1ea   : > { %4441 = vst [vmem:[%s6410_s12 + $0x8] sm:$0xff] %v4359_v54   ;;  %v4354_v19 = vpack.c.bf16 %v3715_v45, %v3714_v24  ;;  %v3642_v29 = vadd.f32 %v4942_v34, %v3328_v55  ;;  %v3682_v56 = vadd.f32 %v6396_v14, %v3639_v62  ;;  %v3213_v57 = vpop.f32.mrf.mxu1  ;;  %v3720_v58 = vmax.f32 %v3684_v40, 0.0 }
 0x1eb   : > { %v3511_v7 = vpop.f32.mrf.mxu0  ;;  %v3330_v0 = vadd.f32 %v3213_v57, %v6320_v42 }
 0x1ec   : > { %4355 = vst [vmem:[%s6410_s12] sm:$0xff] %v4354_v19   ;;  %v3685_v60 = vadd.f32 %v6396_v14, %v3642_v29  ;;  %v3640_v2 = vadd.f32 %v3511_v7, %v3326_v5  ;;  %v4911_v8 = vpop.f32.mrf.mxu1  ;;  %v3718_v6 = vmax.f32 %v3682_v56, 0.0 }
 0x1ed   : > { %v4945_v25 = vpop.f32.mrf.mxu0  ;;  %v3335_v54 = vadd.f32 %v4911_v8, %v6323_v47 }
 0x1ee   : > { %v3721_v33 = vmax.f32 %v3685_v60, 0.0  ;;  %v3683_v31 = vadd.f32 %v6396_v14, %v3640_v2  ;;  %v3645_v37 = vadd.f32 %v4945_v25, %v3331_v16  ;;  %v3226_v18 = vpop.f32.mrf.mxu1 }
 0x1ef   : > { %v3524_v63 = vpop.f32.mrf.mxu0  ;;  %v3333_v29 = vadd.f32 %v3226_v18, %v6326_v11 }
 0x1f0   : > { %v4369_v17 = vpack.c.bf16 %v3721_v33, %v3720_v58  ;;  %v3719_v4 = vmax.f32 %v3683_v31, 0.0  ;;  %v3643_v22 = vadd.f32 %v3524_v63, %v3329_v61  ;;  %v3688_v51 = vadd.f32 %v6396_v14, %v3645_v37  ;;  %v4912_v55 = vpop.f32.mrf.mxu1 }
 0x1f1   : > { %v4946_v12 = vpop.f32.mrf.mxu0  ;;  %v3336_v47 = vadd.f32 %v4912_v55, %v6329_v1 }
 0x1f2   : > { %4443 = vst [vmem:[%s6410_s12 + $0x18] sm:$0xff] %v4369_v17   ;;  %v4364_v27 = vpack.c.bf16 %v3719_v4, %v3718_v6  ;;  %v3646_v24 = vadd.f32 %v4946_v12, %v3332_v46  ;;  %v3686_v45 = vadd.f32 %v6396_v14, %v3643_v22  ;;  %v3229_v62 = vpop.f32.mrf.mxu1  ;;  %v3724_v5 = vmax.f32 %v3688_v51, 0.0 }
 0x1f3   : > { %v3527_v13 = vpop.f32.mrf.mxu0  ;;  %v3334_v58 = vadd.f32 %v3229_v62, %v6332_v50 }
 0x1f4   : > { %4442 = vst [vmem:[%s6410_s12 + $0x10] sm:$0xff] %v4364_v27   ;;  %v3689_v28 = vadd.f32 %v6396_v14, %v3646_v24  ;;  %v3644_v30 = vadd.f32 %v3527_v13, %v3330_v0  ;;  %v4915_v21 = vpop.f32.mrf.mxu1  ;;  %v3722_v16 = vmax.f32 %v3686_v45, 0.0 }
 0x1f5   : > { %v4949_v34 = vpop.f32.mrf.mxu0  ;;  %v3339_v8 = vadd.f32 %v4915_v21, %v6335_v41 }
 0x1f6   : > { %v3725_v19 = vmax.f32 %v3689_v28, 0.0  ;;  %v3687_v42 = vadd.f32 %v6396_v14, %v3644_v30  ;;  %v3649_v40 = vadd.f32 %v4949_v34, %v3335_v54  ;;  %v3242_v2 = vpop.f32.mrf.mxu1 }
 0x1f7   : > { %v3540_v7 = vpop.f32.mrf.mxu0  ;;  %v3337_v12 = vadd.f32 %v3242_v2, %v6338_v52 }
 0x1f8   : > { %v4379_v56 = vpack.c.bf16 %v3725_v19, %v3724_v5  ;;  %v3723_v60 = vmax.f32 %v3687_v42, 0.0  ;;  %v3647_v57 = vadd.f32 %v3540_v7, %v3333_v29  ;;  %v3692_v31 = vadd.f32 %v6396_v14, %v3649_v40  ;;  %v4916_v61 = vpop.f32.mrf.mxu1 }
 0x1f9   : > { %v4950_v25 = vpop.f32.mrf.mxu0  ;;  %v3340_v41 = vadd.f32 %v4916_v61, %v6341_v49 }
 0x1fa   : > { %4445 = vst [vmem:[%s6410_s12 + $0x28] sm:$0xff] %v4379_v56   ;;  %v4374_v33 = vpack.c.bf16 %v3723_v60, %v3722_v16  ;;  %v3650_v37 = vadd.f32 %v4950_v25, %v3336_v47  ;;  %v3690_v63 = vadd.f32 %v6396_v14, %v3647_v57  ;;  %v3245_v46 = vpop.f32.mrf.mxu1  ;;  %v3728_v4 = vmax.f32 %v3692_v31, 0.0 }
 0x1fb   : > { %v3543_v11 = vpop.f32.mrf.mxu0  ;;  %v3338_v28 = vadd.f32 %v3245_v46, %v6344_v26 }
 0x1fc   : > { %4444 = vst [vmem:[%s6410_s12 + $0x20] sm:$0xff] %v4374_v33   ;;  %v3693_v1 = vadd.f32 %v6396_v14, %v3650_v37  ;;  %v3648_v6 = vadd.f32 %v3543_v11, %v3334_v58  ;;  %v4919_v0 = vpop.f32.mrf.mxu1  ;;  %v3726_v51 = vmax.f32 %v3690_v63, 0.0 }
 0x1fd   : > { %v4953_v17 = vpop.f32.mrf.mxu0  ;;  %v3343_v19 = vadd.f32 %v4919_v0, %v6347_v10 }
 0x1fe   : > { %v3729_v18 = vmax.f32 %v3693_v1, 0.0  ;;  %v3691_v50 = vadd.f32 %v6396_v14, %v3648_v6  ;;  %v3653_v22 = vadd.f32 %v4953_v17, %v3339_v8  ;;  %v3258_v13 = vpop.f32.mrf.mxu1 }
 0x1ff   : > { %v3556_v27 = vpop.f32.mrf.mxu0  ;;  %v3341_v56 = vadd.f32 %v3258_v13, %v6350_v3 }
 0x200   : > { %v4389_v24 = vpack.c.bf16 %v3729_v18, %v3728_v4  ;;  %v3727_v55 = vmax.f32 %v3691_v50, 0.0  ;;  %v3651_v54 = vadd.f32 %v3556_v27, %v3337_v12  ;;  %v3696_v62 = vadd.f32 %v6396_v14, %v3653_v22  ;;  %v4920_v5 = vpop.f32.mrf.mxu1 }
 0x201   : > { %v4954_v45 = vpop.f32.mrf.mxu0  ;;  %v3344_v10 = vadd.f32 %v4920_v5, %v6353_v43 }
 0x202   : > { %4447 = vst [vmem:[%s6410_s12 + $0x38] sm:$0xff] %v4389_v24   ;;  %v4384_v30 = vpack.c.bf16 %v3727_v55, %v3726_v51  ;;  %v3654_v34 = vadd.f32 %v4954_v45, %v3340_v41  ;;  %v3694_v42 = vadd.f32 %v6396_v14, %v3651_v54  ;;  %v3261_v29 = vpop.f32.mrf.mxu1  ;;  %v3732_v7 = vmax.f32 %v3696_v62, 0.0 }
 0x203   : > { %v3559_v52 = vpop.f32.mrf.mxu0  ;;  %v3342_v61 = vadd.f32 %v3261_v29, %v6356_v32 }
 0x204   : > { %4446 = vst [vmem:[%s6410_s12 + $0x30] sm:$0xff] %v4384_v30   ;;  %v3697_v49 = vadd.f32 %v6396_v14, %v3654_v34  ;;  %v3652_v40 = vadd.f32 %v3559_v52, %v3338_v28  ;;  %v4923_v60 = vpop.f32.mrf.mxu1  ;;  %v3730_v57 = vmax.f32 %v3694_v42, 0.0 }
 0x205   : > { %v4957_v21 = vpop.f32.mrf.mxu0  ;;  %v3347_v6 = vadd.f32 %v4923_v60, %v6359_v9 }
 0x206   : > { %v3733_v16 = vmax.f32 %v3697_v49, 0.0  ;;  %v3695_v26 = vadd.f32 %v6396_v14, %v3652_v40  ;;  %v3657_v47 = vadd.f32 %v4957_v21, %v3343_v19  ;;  %v3274_v33 = vpop.f32.mrf.mxu1 }
 0x207   : > { %v3572_v2 = vpop.f32.mrf.mxu0  ;;  %v3345_v0 = vadd.f32 %v3274_v33, %v6362_v38 }
 0x208   : > { %v4399_v25 = vpack.c.bf16 %v3733_v16, %v3732_v7  ;;  %v3731_v58 = vmax.f32 %v3695_v26, 0.0  ;;  %v3655_v31 = vadd.f32 %v3572_v2, %v3341_v56  ;;  %v3700_v8 = vadd.f32 %v6396_v14, %v3657_v47  ;;  %v4924_v1 = vpop.f32.mrf.mxu1 }
 0x209   : > { %v4958_v37 = vpop.f32.mrf.mxu0  ;;  %v3348_v9 = vadd.f32 %v4924_v1, %v6365_v23 }
 0x20a   : > { %4449 = vst [vmem:[%s6410_s12 + $0x48] sm:$0xff] %v4399_v25   ;;  %v4394_v11 = vpack.c.bf16 %v3731_v58, %v3730_v57  ;;  %v3658_v63 = vadd.f32 %v4958_v37, %v3344_v10  ;;  %v3698_v46 = vadd.f32 %v6396_v14, %v3655_v31  ;;  %v3277_v4 = vpop.f32.mrf.mxu1  ;;  %v3736_v50 = vmax.f32 %v3700_v8, 0.0 }
 0x20b   : > { %v3575_v3 = vpop.f32.mrf.mxu0  ;;  %v3346_v28 = vadd.f32 %v3277_v4, %v6368_v53 }
 0x20c   : > { %4448 = vst [vmem:[%s6410_s12 + $0x40] sm:$0xff] %v4394_v11   ;;  %v3701_v43 = vadd.f32 %v6396_v14, %v3658_v63  ;;  %v3656_v17 = vadd.f32 %v3575_v3, %v3342_v61  ;;  %v4927_v27 = vpop.f32.mrf.mxu1  ;;  %v3734_v41 = vmax.f32 %v3698_v46, 0.0 }
 0x20d   : > { %v4961_v18 = vpop.f32.mrf.mxu0  ;;  %v3351_v52 = vadd.f32 %v4927_v27, %v6371_v36 }
 0x20e   : > { %v3737_v22 = vmax.f32 %v3701_v43, 0.0  ;;  %v3699_v32 = vadd.f32 %v6396_v14, %v3656_v17  ;;  %v3661_v12 = vadd.f32 %v4961_v18, %v3347_v6  ;;  %v3290_v13 = vpop.f32.mrf.mxu1 }
 0x20f   : > { %v3588_v51 = vpop.f32.mrf.mxu0  ;;  %v3349_v16 = vadd.f32 %v3290_v13, %v6374_v35 }
 0x210   : > { %v4409_v24 = vpack.c.bf16 %v3737_v22, %v3736_v50  ;;  %v3735_v55 = vmax.f32 %v3699_v32, 0.0  ;;  %v3659_v54 = vadd.f32 %v3588_v51, %v3345_v0  ;;  %v3704_v62 = vadd.f32 %v6396_v14, %v3661_v12  ;;  %v4928_v5 = vpop.f32.mrf.mxu1 }
 0x211   : > { %v4962_v45 = vpop.f32.mrf.mxu0  ;;  %v3352_v36 = vadd.f32 %v4928_v5, %v6377_v44 }
 0x212   : > { %4451 = vst [vmem:[%s6410_s12 + $0x58] sm:$0xff] %v4409_v24   ;;  %v4404_v30 = vpack.c.bf16 %v3735_v55, %v3734_v41  ;;  %v3662_v34 = vadd.f32 %v4962_v45, %v3348_v9  ;;  %v3702_v19 = vadd.f32 %v6396_v14, %v3659_v54  ;;  %v3293_v49 = vpop.f32.mrf.mxu1  ;;  %v3740_v29 = vmax.f32 %v3704_v62, 0.0 }
 0x213   : > { %v3591_v38 = vpop.f32.mrf.mxu0  ;;  %v3350_v33 = vadd.f32 %v3293_v49, %v6380_v15 }
 0x214   : > { %4450 = vst [vmem:[%s6410_s12 + $0x50] sm:$0xff] %v4404_v30   ;;  %v3705_v23 = vadd.f32 %v6396_v14, %v3662_v34  ;;  %v3660_v42 = vadd.f32 %v3591_v38, %v3346_v28  ;;  %v4931_v26 = vpop.f32.mrf.mxu1  ;;  %v3738_v56 = vmax.f32 %v3702_v19, 0.0 }
 0x215   : > { %v4965_v40 = vpop.f32.mrf.mxu0  ;;  %v3355_v11 = vadd.f32 %v4931_v26, %v6383_v20 }
 0x216   : > { %v3741_v21 = vmax.f32 %v3705_v23, 0.0  ;;  %v3703_v53 = vadd.f32 %v6396_v14, %v3660_v42  ;;  %v3665_v7 = vadd.f32 %v4965_v40, %v3351_v52  ;;  %v3306_v10 = vpop.f32.mrf.mxu1 }
 0x217   : > { %v3604_v47 = vpop.f32.mrf.mxu0  ;;  %v3353_v6 = vadd.f32 %v3306_v10, %v6385_v39 }
 0x218   : > { %v4419_v60 = vpack.c.bf16 %v3741_v21, %v3740_v29  ;;  %v3739_v2 = vmax.f32 %v3703_v53, 0.0  ;;  %v3708_v57 = vadd.f32 %v6396_v14, %v3665_v7  ;;  %v3663_v25 = vadd.f32 %v3604_v47, %v3349_v16  ;;  %v4932_v61 = vpop.f32.mrf.mxu1 }
 0x219   : > { %v4966_v58 = vpop.f32.mrf.mxu0  ;;  %v3356_v17 = vadd.f32 %v4932_v61, %v6387_v59 }
 0x21a   : > { %4453 = vst [vmem:[%s6410_s12 + $0x68] sm:$0xff] %v4419_v60   ;;  %v4414_v31 = vpack.c.bf16 %v3739_v2, %v3738_v56  ;;  %v3666_v37 = vadd.f32 %v4966_v58, %v3352_v36  ;;  %v3706_v8 = vadd.f32 %v6396_v14, %v3663_v25  ;;  %v3744_v1 = vmax.f32 %v3708_v57, 0.0  ;;  %v3309_v4 = vpop.f32.mrf.mxu1 }
 0x21b   : > { %v3607_v35 = vpop.f32.mrf.mxu0  ;;  %v3354_v0 = vadd.f32 %v3309_v4, %v6390_v48 }
 0x21c   : > { %4452 = vst [vmem:[%s6410_s12 + $0x60] sm:$0xff] %v4414_v31   ;;  %v3709_v44 = vadd.f32 %v6396_v14, %v3666_v37  ;;  %v3664_v63 = vadd.f32 %v3607_v35, %v3350_v33  ;;  %v3742_v20 = vmax.f32 %v3706_v8, 0.0 }
 0x21d   : > { %v4969_v3 = vpop.f32.mrf.mxu0 }
 0x21e   : > { %v3745_v46 = vmax.f32 %v3709_v44, 0.0  ;;  %v3707_v15 = vadd.f32 %v6396_v14, %v3664_v63  ;;  %v3669_v43 = vadd.f32 %v4969_v3, %v3355_v11 }
 0x21f   : > { %v3620_v18 = vpop.f32.mrf.mxu0 }
 0x220   : > { %v4429_v50 = vpack.c.bf16 %v3745_v46, %v3744_v1  ;;  %v3743_v22 = vmax.f32 %v3707_v15, 0.0  ;;  %v3667_v32 = vadd.f32 %v3620_v18, %v3353_v6  ;;  %v3712_v39 = vadd.f32 %v6396_v14, %v3669_v43 }
 0x221   : > { %v4970_v12 = vpop.f32.mrf.mxu0 }
 0x222   : > { %4455 = vst [vmem:[%s6410_s12 + $0x78] sm:$0xff] %v4429_v50   ;;  %v4424_v27 = vpack.c.bf16 %v3743_v22, %v3742_v20  ;;  %v3670_v51 = vadd.f32 %v4970_v12, %v3356_v17  ;;  %v3710_v59 = vadd.f32 %v6396_v14, %v3667_v32  ;;  %v3748_v55 = vmax.f32 %v3712_v39, 0.0 }
 0x223   : > { %v3623_v41 = vpop.f32.mrf.mxu0 }
 0x224   : > { %4454 = vst [vmem:[%s6410_s12 + $0x70] sm:$0xff] %v4424_v27   ;;  %v3713_v9 = vadd.f32 %v6396_v14, %v3670_v51  ;;  %v3668_v24 = vadd.f32 %v3623_v41, %v3354_v0  ;;  %v3746_v45 = vmax.f32 %v3710_v59, 0.0 }
 0x226   : > { %v3749_v13 = vmax.f32 %v3713_v9, 0.0  ;;  %v3711_v54 = vadd.f32 %v6396_v14, %v3668_v24 }
 0x228   : > { %v4439_v28 = vpack.c.bf16 %v3749_v13, %v3748_v55  ;;  %v3747_v30 = vmax.f32 %v3711_v54, 0.0 }
 0x22a   : > { %4457 = vst [vmem:[%s6410_s12 + $0x88] sm:$0xff] %v4439_v28   ;;  %v4434_v48 = vpack.c.bf16 %v3747_v30, %v3746_v45 }
 0x22c   : > { %4456 = vst [vmem:[%s6410_s12 + $0x80] sm:$0xff] %v4434_v48  }
 0x22d PF: > { %s13_s14 = sadd.s32 1, %s5093_s14   ;;  %s6543_s12 = smov %s5089_s13 }
 0x22e   : > { %p10_p5 = scmp.ge.s32.totalorder %s13_s14, 4   ;;  %s6544_s13 = smov %s6546_s15 }
 0x230   :  { %12 = sbr.rel (!%p10_p5) target bundleno = 2 (0x2), region = 76 }

</bundles_post_ra>
